<compile_context>
chip_gen: v7x
topology: tpu7x:2x2x1
jax: 0.10.0
libtpu: 0.0.40
codegen_flags: <defaults>
</compile_context>

<pallas_src>
import functools

import jax
import jax.numpy as jnp
from jax import lax
from jax.experimental import pallas as pl
from jax.experimental.pallas import tpu as pltpu

EPS = 1e-5


def basic_block_kernel(x_ref, band1_ref, g1_ref, b1_ref,
                       band2_ref, g2_ref, b2_ref, fold_ref, spread_ref,
                       o_ref, xpad_ref, *, n, c, h, w, wt):
    """Fused conv1+bn1+relu -> conv2+bn2+add+relu.

    x_ref:    (H*N, W*C)      f32, rows ordered (h, n) i.e. row = h*N + n.
    bandX:    (3, (WT+2)*C, WT*C) bf16 tile-invariant block-banded conv weights.
    gX/bX:    (1, C)          f32 BN affine params.
    fold:     (WT*C, C)       f32, fold[j, co] = 1 iff j % C == co.
    spread:   (C, WT*C)       f32 (= fold.T).
    o_ref:    (H*N, W*C)      f32 output.
    xpad_ref: ((H+2)*N, (W+2)*C) f32 scratch with height AND width halos.
    """
    rows = h * n                 # matmul M dim
    nt = w // wt                 # number of width tiles
    kin = (wt + 2) * c           # per-tile contraction size (band-sparse K)
    tout = wt * c                # per-tile output lanes
    npix = float(n * h * w)
    wpc = (w + 2) * c

    # --- zero ONLY the halo rows / columns (interior is fully written below) ---
    xpad_ref[0:n, :] = jnp.zeros((n, wpc), jnp.float32)                     # top halo
    xpad_ref[(h + 1) * n:(h + 2) * n, :] = jnp.zeros((n, wpc), jnp.float32)  # bottom halo
    xpad_ref[:, 0:c] = jnp.zeros(((h + 2) * n, c), jnp.float32)             # left halo
    xpad_ref[:, (w + 1) * c:] = jnp.zeros(((h + 2) * n, c), jnp.float32)    # right halo

    # interior <- x (f32 scratch; bf16 cast happens only at the MXU operand)
    xpad_ref[n:(h + 1) * n, c:(w + 1) * c] = x_ref[...]

    def conv_bn(band_ref, g_ref, b_ref):
        """Width-tiled banded conv + training-mode BN (one-pass variance).

        Returns (per-tile f32 conv tiles, lane-spread scale, lane-spread bias)."""
        tiles = []
        stat_l = jnp.zeros((2, tout), jnp.float32)   # [col_sum; col_sumsq], tile-accumulated
        for t in range(nt):
            acc = jnp.zeros((rows, tout), jnp.float32)
            for kh in range(3):
                # contiguous 2-D row slice (H-major/N-minor order => no merged reshape)
                lhs = xpad_ref[kh * n:kh * n + rows,
                               t * wt * c:t * wt * c + kin]
                acc = acc + jnp.dot(lhs.astype(jnp.bfloat16), band_ref[kh],
                                    preferred_element_type=jnp.float32)
            tiles.append(acc)
            stat_l = stat_l + jnp.concatenate(
                [jnp.sum(acc, axis=0, keepdims=True),
                 jnp.sum(acc * acc, axis=0, keepdims=True)], axis=0)

        # Per-channel batch stats (biased, over N,H,W): one fold dot for sum+sumsq.
        stat_c = jnp.dot(stat_l, fold_ref[...],
                         preferred_element_type=jnp.float32) / npix          # (2, C)
        mean_c = stat_c[0:1]
        var_c = stat_c[1:2] - mean_c * mean_c                                # one-pass var
        inv_c = lax.rsqrt(var_c + EPS)                                       # EUP
        scale_c = g_ref[...] * inv_c                                         # (1, C)
        bias_c = b_ref[...] - mean_c * scale_c                               # (1, C)
        # Single tiny spread dot on the serial chain (scale & bias together).
        sb_l = jnp.dot(jnp.concatenate([scale_c, bias_c], axis=0),
                       spread_ref[...], preferred_element_type=jnp.float32)  # (2, WT*C)
        return tiles, sb_l[0:1], sb_l[1:2]

    # ---- Stage 1: y1 = relu(bn1(conv1(x))); y1 replaces x in the scratch interior ----
    tiles1, sc1, bi1 = conv_bn(band1_ref, g1_ref, b1_ref)
    for t in range(nt):
        y = jnp.maximum(tiles1[t] * sc1 + bi1, 0.0)
        xpad_ref[n:(h + 1) * n, c + t * tout:c + (t + 1) * tout] = y

    # ---- Stage 2: out = relu(bn2(conv2(y1)) + x)  (identity residual, no downsample) ----
    tiles2, sc2, bi2 = conv_bn(band2_ref, g2_ref, b2_ref)
    for t in range(nt):
        y = tiles2[t] * sc2 + bi2
        y = y + x_ref[:, t * tout:(t + 1) * tout]     # residual: re-read VMEM-resident x
        o_ref[:, t * tout:(t + 1) * tout] = jnp.maximum(y, 0.0).astype(o_ref.dtype)


def _tile_band_weights(w_hwio, wt):
    """(3,3,Cin,Cout) -> (3, (WT+2)*Cin, WT*Cout) tile-invariant block-banded weights.

    band[kh, li*Cin+ci, wo*Cout+co] = w[kh, kw, ci, co] with kw = li - wo in {0,1,2};
    identical for every width tile because width zero-padding lives in the slab halo.
    """
    _, _, cin, cout = w_hwio.shape
    band = jnp.zeros((3, (wt + 2) * cin, wt * cout), w_hwio.dtype)
    for wo in range(wt):
        for kw in range(3):
            li = wo + kw
            band = band.at[:, li * cin:(li + 1) * cin,
                           wo * cout:(wo + 1) * cout].set(w_hwio[:, kw])
    return band.astype(jnp.bfloat16)


def _fold_spread(wt, cout):
    eye = jnp.eye(cout, dtype=jnp.float32)
    fold = jnp.tile(eye, (wt, 1))            # (WT*Cout, Cout)
    return fold, fold.T                      # spread: (Cout, WT*Cout)


@functools.partial(jax.jit, static_argnames=("wt",))
def basic_block_forward(x_nchw, w1, g1, b1, w2, g2, b2, *, wt):
    """x_nchw: (N, C, H, W) like PyTorch; returns (N, C, H, W)."""
    n, c, hh, ww = x_nchw.shape
    assert ww % wt == 0, "output width must divide into WT-sized tiles"

    # Lane-dense slab, H-major / N-minor rows: row = h*N + n, lane = w*C + c.
    x = jnp.transpose(x_nchw, (2, 0, 3, 1)).reshape(hh * n, ww * c)
    band1 = _tile_band_weights(w1, wt)
    band2 = _tile_band_weights(w2, wt)
    fold, spread = _fold_spread(wt, c)

    kernel = functools.partial(basic_block_kernel, n=n, c=c, h=hh, w=ww, wt=wt)
    out = pl.pallas_call(
        kernel,
        out_shape=jax.ShapeDtypeStruct((hh * n, ww * c), x_nchw.dtype),
        in_specs=[pl.BlockSpec(memory_space=pltpu.MemorySpace.VMEM)] * 9,
        out_specs=pl.BlockSpec(memory_space=pltpu.MemorySpace.VMEM),
        scratch_shapes=[pltpu.VMEM(((hh + 2) * n, (ww + 2) * c), jnp.float32)],
        # Explicit VMEM budget (actual footprint here is ~100 KiB; re-derive per chip
        # generation when tiling real ResNet shapes: <=~48 MiB usable on v7x).
        compiler_params=pltpu.CompilerParams(vmem_limit_bytes=32 * 1024 * 1024),
    )(x, band1, g1, b1, band2, g2, b2, fold, spread)

    return jnp.transpose(out.reshape(hh, n, ww, c), (1, 3, 0, 2))


def _ref_forward(x_nchw, w1, g1, b1, w2, g2, b2):
    """Pure-JAX f32 reference (lax conv) for validation."""
    x = jnp.transpose(x_nchw, (0, 2, 3, 1))

    def conv(a, wgt):
        return lax.conv_general_dilated(
            a, wgt, (1, 1), ((1, 1), (1, 1)),
            dimension_numbers=("NHWC", "HWIO", "NHWC"))

    def bn(a, g, b):
        mean = jnp.mean(a, axis=(0, 1, 2), keepdims=True)
        var = jnp.mean((a - mean) ** 2, axis=(0, 1, 2), keepdims=True)
        return ((a - mean) / jnp.sqrt(var + EPS) * g.reshape(1, 1, 1, -1)
                + b.reshape(1, 1, 1, -1))

    out = jax.nn.relu(bn(conv(x, w1), g1, b1))
    out = jax.nn.relu(bn(conv(out, w2), g2, b2) + x)
    return jnp.transpose(out, (0, 3, 1, 2))


if __name__ == "__main__":
    # BasicBlock(inplanes=4, planes=4, stride=1, downsample=None)
    N, C, H, W = 2, 4, 16, 16
    key = jax.random.PRNGKey(0)
    kx, kw1, kw2 = jax.random.split(key, 3)

    x = jax.random.normal(kx, (N, C, H, W), jnp.float32)
    # Conv weights in HWIO; BN: gamma=1, beta=0 (PyTorch default init).
    w1 = jax.random.normal(kw1, (3, 3, C, C), jnp.float32) * 0.1
    w2 = jax.random.normal(kw2, (3, 3, C, C), jnp.float32) * 0.1
    g1 = jnp.ones((1, C), jnp.float32)
    b1 = jnp.zeros((1, C), jnp.float32)
    g2 = jnp.ones((1, C), jnp.float32)
    b2 = jnp.zeros((1, C), jnp.float32)

    # WT=8 -> 2 width tiles at this toy shape; at real ResNet C>=64 pick WT so
    # WT*Cout ~ 128..256 lanes (e.g. WT=2), cutting the banded-MAC waste to ~1.3x.
    out = jax.block_until_ready(basic_block_forward(x, w1, g1, b1, w2, g2, b2, wt=8))
    ref = _ref_forward(x, w1, g1, b1, w2, g2, b2)

    assert out.shape == (N, C, H, W)
    max_err = float(jnp.max(jnp.abs(out - ref)))
    # bf16 MXU operands (f32 accumulation) vs an all-f32 reference.
    assert jnp.allclose(out, ref, rtol=5e-2, atol=5e-2), (
        f"mismatch vs JAX reference (max abs err {max_err})")

    print("KERNEL_OK")
</pallas_src>

<mosaic_0001>
module attributes {stable_mosaic.version = 11 : i64} {
  func.func @basic_block_kernel(%arg0: memref<32x64xf32, #tpu.memory_space<vmem>>, %arg1: memref<3x40x32xbf16, #tpu.memory_space<vmem>>, %arg2: memref<1x4xf32, #tpu.memory_space<vmem>>, %arg3: memref<1x4xf32, #tpu.memory_space<vmem>>, %arg4: memref<3x40x32xbf16, #tpu.memory_space<vmem>>, %arg5: memref<1x4xf32, #tpu.memory_space<vmem>>, %arg6: memref<1x4xf32, #tpu.memory_space<vmem>>, %arg7: memref<32x4xf32, #tpu.memory_space<vmem>>, %arg8: memref<4x32xf32, #tpu.memory_space<vmem>>, %arg9: memref<32x64xf32, #tpu.memory_space<vmem>>, %arg10: memref<36x72xf32, #tpu.memory_space<vmem>>) attributes {dimension_semantics = [], scalar_prefetch = 0 : i64, scratch_operands = 1 : i64, tpu.core_type = #tpu.core_type<tc>} {
    %cst = arith.constant 0.000000e+00 : f32
    %0 = vector.broadcast %cst : f32 to vector<2x72xf32>
    %c0 = arith.constant 0 : index
    %c0_0 = arith.constant 0 : index
    %1 = vector.load %arg10[%c0, %c0_0] : memref<36x72xf32, #tpu.memory_space<vmem>>, vector<2x72xf32>
    tpu.vector_store %arg10[%c0, %c0_0], %0 {strides = array<i32>} : memref<36x72xf32, #tpu.memory_space<vmem>>, vector<2x72xf32>,
    %cst_1 = arith.constant 0.000000e+00 : f32
    %2 = vector.broadcast %cst_1 : f32 to vector<2x72xf32>
    %c34 = arith.constant 34 : index
    %c0_2 = arith.constant 0 : index
    %3 = vector.load %arg10[%c34, %c0_2] : memref<36x72xf32, #tpu.memory_space<vmem>>, vector<2x72xf32>
    tpu.vector_store %arg10[%c34, %c0_2], %2 {strides = array<i32>} : memref<36x72xf32, #tpu.memory_space<vmem>>, vector<2x72xf32>,
    %cst_3 = arith.constant 0.000000e+00 : f32
    %4 = vector.broadcast %cst_3 : f32 to vector<36x4xf32>
    %c0_4 = arith.constant 0 : index
    %c0_5 = arith.constant 0 : index
    %5 = vector.load %arg10[%c0_4, %c0_5] : memref<36x72xf32, #tpu.memory_space<vmem>>, vector<36x4xf32>
    tpu.vector_store %arg10[%c0_4, %c0_5], %4 {strides = array<i32>} : memref<36x72xf32, #tpu.memory_space<vmem>>, vector<36x4xf32>,
    %cst_6 = arith.constant 0.000000e+00 : f32
    %6 = vector.broadcast %cst_6 : f32 to vector<36x4xf32>
    %c0_7 = arith.constant 0 : index
    %c68 = arith.constant 68 : index
    %7 = vector.load %arg10[%c0_7, %c68] : memref<36x72xf32, #tpu.memory_space<vmem>>, vector<36x4xf32>
    tpu.vector_store %arg10[%c0_7, %c68], %6 {strides = array<i32>} : memref<36x72xf32, #tpu.memory_space<vmem>>, vector<36x4xf32>,
    %c0_8 = arith.constant 0 : index
    %c0_9 = arith.constant 0 : index
    %8 = vector.load %arg0[%c0_8, %c0_9] : memref<32x64xf32, #tpu.memory_space<vmem>>, vector<32x64xf32>
    %c2 = arith.constant 2 : index
    %c4 = arith.constant 4 : index
    %9 = vector.load %arg10[%c2, %c4] : memref<36x72xf32, #tpu.memory_space<vmem>>, vector<32x64xf32>
    tpu.vector_store %arg10[%c2, %c4], %8 {strides = array<i32>} : memref<36x72xf32, #tpu.memory_space<vmem>>, vector<32x64xf32>,
    %cst_10 = arith.constant 0.000000e+00 : f32
    %10 = vector.broadcast %cst_10 : f32 to vector<2x32xf32>
    %cst_11 = arith.constant 0.000000e+00 : f32
    %11 = vector.broadcast %cst_11 : f32 to vector<32x32xf32>
    %c0_12 = arith.constant 0 : index
    %c0_13 = arith.constant 0 : index
    %12 = vector.load %arg10[%c0_12, %c0_13] : memref<36x72xf32, #tpu.memory_space<vmem>>, vector<32x40xf32>
    %13 = arith.truncf %12 : vector<32x40xf32> to vector<32x40xbf16>
    %c0_14 = arith.constant 0 : index
    %c0_15 = arith.constant 0 : index
    %c0_16 = arith.constant 0 : index
    %14 = vector.load %arg1[%c0_14, %c0_15, %c0_16] : memref<3x40x32xbf16, #tpu.memory_space<vmem>>, vector<1x40x32xbf16>
    %15 = vector.shape_cast %14 : vector<1x40x32xbf16> to vector<40x32xbf16>
    %cst_17 = arith.constant dense<0.000000e+00> : vector<32x32xf32>
    %16 = tpu.matmul %13, %15, %cst_17 {dimension_numbers = #tpu.dot_dimension_numbers<[1], [0], [0], [1], [0, 0, 1, 1], [], []>} : vector<32x40xbf16>, vector<40x32xbf16>, vector<32x32xf32> -> vector<32x32xf32>
    %17 = arith.addf %11, %16 : vector<32x32xf32>
    %c2_18 = arith.constant 2 : index
    %c0_19 = arith.constant 0 : index
    %18 = vector.load %arg10[%c2_18, %c0_19] : memref<36x72xf32, #tpu.memory_space<vmem>>, vector<32x40xf32>
    %19 = arith.truncf %18 : vector<32x40xf32> to vector<32x40xbf16>
    %c1 = arith.constant 1 : index
    %c0_20 = arith.constant 0 : index
    %c0_21 = arith.constant 0 : index
    %20 = vector.load %arg1[%c1, %c0_20, %c0_21] : memref<3x40x32xbf16, #tpu.memory_space<vmem>>, vector<1x40x32xbf16>
    %21 = vector.shape_cast %20 : vector<1x40x32xbf16> to vector<40x32xbf16>
    %cst_22 = arith.constant dense<0.000000e+00> : vector<32x32xf32>
    %22 = tpu.matmul %19, %21, %cst_22 {dimension_numbers = #tpu.dot_dimension_numbers<[1], [0], [0], [1], [0, 0, 1, 1], [], []>} : vector<32x40xbf16>, vector<40x32xbf16>, vector<32x32xf32> -> vector<32x32xf32>
    %23 = arith.addf %17, %22 : vector<32x32xf32>
    %c4_23 = arith.constant 4 : index
    %c0_24 = arith.constant 0 : index
    %24 = vector.load %arg10[%c4_23, %c0_24] : memref<36x72xf32, #tpu.memory_space<vmem>>, vector<32x40xf32>
    %25 = arith.truncf %24 : vector<32x40xf32> to vector<32x40xbf16>
    %c2_25 = arith.constant 2 : index
    %c0_26 = arith.constant 0 : index
    %c0_27 = arith.constant 0 : index
    %26 = vector.load %arg1[%c2_25, %c0_26, %c0_27] : memref<3x40x32xbf16, #tpu.memory_space<vmem>>, vector<1x40x32xbf16>
    %27 = vector.shape_cast %26 : vector<1x40x32xbf16> to vector<40x32xbf16>
    %cst_28 = arith.constant dense<0.000000e+00> : vector<32x32xf32>
    %28 = tpu.matmul %25, %27, %cst_28 {dimension_numbers = #tpu.dot_dimension_numbers<[1], [0], [0], [1], [0, 0, 1, 1], [], []>} : vector<32x40xbf16>, vector<40x32xbf16>, vector<32x32xf32> -> vector<32x32xf32>
    %29 = arith.addf %23, %28 : vector<32x32xf32>
    %cst_29 = arith.constant dense<0.000000e+00> : vector<32xf32>
    %30 = vector.multi_reduction <add>, %29, %cst_29 [0] : vector<32x32xf32> to vector<32xf32>
    %31 = vector.shape_cast %30 : vector<32xf32> to vector<1x32xf32>
    %32 = arith.mulf %29, %29 : vector<32x32xf32>
    %cst_30 = arith.constant dense<0.000000e+00> : vector<32xf32>
    %33 = vector.multi_reduction <add>, %32, %cst_30 [0] : vector<32x32xf32> to vector<32xf32>
    %34 = vector.shape_cast %33 : vector<32xf32> to vector<1x32xf32>
    %35 = tpu.concatenate %31, %34 in 0 : vector<1x32xf32>, vector<1x32xf32> -> vector<2x32xf32>
    %36 = arith.addf %10, %35 : vector<2x32xf32>
    %cst_31 = arith.constant 0.000000e+00 : f32
    %37 = vector.broadcast %cst_31 : f32 to vector<32x32xf32>
    %c0_32 = arith.constant 0 : index
    %c32 = arith.constant 32 : index
    %38 = vector.load %arg10[%c0_32, %c32] : memref<36x72xf32, #tpu.memory_space<vmem>>, vector<32x40xf32>
    %39 = arith.truncf %38 : vector<32x40xf32> to vector<32x40xbf16>
    %c0_33 = arith.constant 0 : index
    %c0_34 = arith.constant 0 : index
    %c0_35 = arith.constant 0 : index
    %40 = vector.load %arg1[%c0_33, %c0_34, %c0_35] : memref<3x40x32xbf16, #tpu.memory_space<vmem>>, vector<1x40x32xbf16>
    %41 = vector.shape_cast %40 : vector<1x40x32xbf16> to vector<40x32xbf16>
    %cst_36 = arith.constant dense<0.000000e+00> : vector<32x32xf32>
    %42 = tpu.matmul %39, %41, %cst_36 {dimension_numbers = #tpu.dot_dimension_numbers<[1], [0], [0], [1], [0, 0, 1, 1], [], []>} : vector<32x40xbf16>, vector<40x32xbf16>, vector<32x32xf32> -> vector<32x32xf32>
    %43 = arith.addf %37, %42 : vector<32x32xf32>
    %c2_37 = arith.constant 2 : index
    %c32_38 = arith.constant 32 : index
    %44 = vector.load %arg10[%c2_37, %c32_38] : memref<36x72xf32, #tpu.memory_space<vmem>>, vector<32x40xf32>
    %45 = arith.truncf %44 : vector<32x40xf32> to vector<32x40xbf16>
    %c1_39 = arith.constant 1 : index
    %c0_40 = arith.constant 0 : index
    %c0_41 = arith.constant 0 : index
    %46 = vector.load %arg1[%c1_39, %c0_40, %c0_41] : memref<3x40x32xbf16, #tpu.memory_space<vmem>>, vector<1x40x32xbf16>
    %47 = vector.shape_cast %46 : vector<1x40x32xbf16> to vector<40x32xbf16>
    %cst_42 = arith.constant dense<0.000000e+00> : vector<32x32xf32>
    %48 = tpu.matmul %45, %47, %cst_42 {dimension_numbers = #tpu.dot_dimension_numbers<[1], [0], [0], [1], [0, 0, 1, 1], [], []>} : vector<32x40xbf16>, vector<40x32xbf16>, vector<32x32xf32> -> vector<32x32xf32>
    %49 = arith.addf %43, %48 : vector<32x32xf32>
    %c4_43 = arith.constant 4 : index
    %c32_44 = arith.constant 32 : index
    %50 = vector.load %arg10[%c4_43, %c32_44] : memref<36x72xf32, #tpu.memory_space<vmem>>, vector<32x40xf32>
    %51 = arith.truncf %50 : vector<32x40xf32> to vector<32x40xbf16>
    %c2_45 = arith.constant 2 : index
    %c0_46 = arith.constant 0 : index
    %c0_47 = arith.constant 0 : index
    %52 = vector.load %arg1[%c2_45, %c0_46, %c0_47] : memref<3x40x32xbf16, #tpu.memory_space<vmem>>, vector<1x40x32xbf16>
    %53 = vector.shape_cast %52 : vector<1x40x32xbf16> to vector<40x32xbf16>
    %cst_48 = arith.constant dense<0.000000e+00> : vector<32x32xf32>
    %54 = tpu.matmul %51, %53, %cst_48 {dimension_numbers = #tpu.dot_dimension_numbers<[1], [0], [0], [1], [0, 0, 1, 1], [], []>} : vector<32x40xbf16>, vector<40x32xbf16>, vector<32x32xf32> -> vector<32x32xf32>
    %55 = arith.addf %49, %54 : vector<32x32xf32>
    %cst_49 = arith.constant dense<0.000000e+00> : vector<32xf32>
    %56 = vector.multi_reduction <add>, %55, %cst_49 [0] : vector<32x32xf32> to vector<32xf32>
    %57 = vector.shape_cast %56 : vector<32xf32> to vector<1x32xf32>
    %58 = arith.mulf %55, %55 : vector<32x32xf32>
    %cst_50 = arith.constant dense<0.000000e+00> : vector<32xf32>
    %59 = vector.multi_reduction <add>, %58, %cst_50 [0] : vector<32x32xf32> to vector<32xf32>
    %60 = vector.shape_cast %59 : vector<32xf32> to vector<1x32xf32>
    %61 = tpu.concatenate %57, %60 in 0 : vector<1x32xf32>, vector<1x32xf32> -> vector<2x32xf32>
    %62 = arith.addf %36, %61 : vector<2x32xf32>
    %c0_51 = arith.constant 0 : index
    %c0_52 = arith.constant 0 : index
    %63 = vector.load %arg7[%c0_51, %c0_52] : memref<32x4xf32, #tpu.memory_space<vmem>>, vector<32x4xf32>
    %cst_53 = arith.constant dense<0.000000e+00> : vector<2x4xf32>
    %64 = tpu.matmul %62, %63, %cst_53 {dimension_numbers = #tpu.dot_dimension_numbers<[1], [0], [0], [1], [0, 0, 1, 1], [], []>} : vector<2x32xf32>, vector<32x4xf32>, vector<2x4xf32> -> vector<2x4xf32>
    %cst_54 = arith.constant 5.120000e+02 : f32
    %65 = vector.broadcast %cst_54 : f32 to vector<2x4xf32>
    %66 = arith.divf %64, %65 : vector<2x4xf32>
    %67 = vector.extract_strided_slice %66 {offsets = [0, 0], sizes = [1, 4], strides = [1, 1]} : vector<2x4xf32> to vector<1x4xf32>
    %68 = vector.extract_strided_slice %66 {offsets = [1, 0], sizes = [1, 4], strides = [1, 1]} : vector<2x4xf32> to vector<1x4xf32>
    %69 = arith.mulf %67, %67 : vector<1x4xf32>
    %70 = arith.subf %68, %69 : vector<1x4xf32>
    %cst_55 = arith.constant 9.99999974E-6 : f32
    %71 = vector.broadcast %cst_55 : f32 to vector<1x4xf32>
    %72 = arith.addf %70, %71 : vector<1x4xf32>
    %73 = math.rsqrt %72 : vector<1x4xf32>
    %c0_56 = arith.constant 0 : index
    %c0_57 = arith.constant 0 : index
    %74 = vector.load %arg2[%c0_56, %c0_57] : memref<1x4xf32, #tpu.memory_space<vmem>>, vector<1x4xf32>
    %75 = arith.mulf %74, %73 : vector<1x4xf32>
    %c0_58 = arith.constant 0 : index
    %c0_59 = arith.constant 0 : index
    %76 = vector.load %arg3[%c0_58, %c0_59] : memref<1x4xf32, #tpu.memory_space<vmem>>, vector<1x4xf32>
    %77 = arith.mulf %67, %75 : vector<1x4xf32>
    %78 = arith.subf %76, %77 : vector<1x4xf32>
    %79 = tpu.concatenate %75, %78 in 0 : vector<1x4xf32>, vector<1x4xf32> -> vector<2x4xf32>
    %c0_60 = arith.constant 0 : index
    %c0_61 = arith.constant 0 : index
    %80 = vector.load %arg8[%c0_60, %c0_61] : memref<4x32xf32, #tpu.memory_space<vmem>>, vector<4x32xf32>
    %cst_62 = arith.constant dense<0.000000e+00> : vector<2x32xf32>
    %81 = tpu.matmul %79, %80, %cst_62 {dimension_numbers = #tpu.dot_dimension_numbers<[1], [0], [0], [1], [0, 0, 1, 1], [], []>} : vector<2x4xf32>, vector<4x32xf32>, vector<2x32xf32> -> vector<2x32xf32>
    %82 = vector.extract_strided_slice %81 {offsets = [0, 0], sizes = [1, 32], strides = [1, 1]} : vector<2x32xf32> to vector<1x32xf32>
    %83 = vector.extract_strided_slice %81 {offsets = [1, 0], sizes = [1, 32], strides = [1, 1]} : vector<2x32xf32> to vector<1x32xf32>
    %84 = vector.broadcast %82 : vector<1x32xf32> to vector<32x32xf32>
    %85 = arith.mulf %29, %84 : vector<32x32xf32>
    %86 = vector.broadcast %83 : vector<1x32xf32> to vector<32x32xf32>
    %87 = arith.addf %85, %86 : vector<32x32xf32>
    %cst_63 = arith.constant 0.000000e+00 : f32
    %88 = vector.broadcast %cst_63 : f32 to vector<32x32xf32>
    %89 = arith.maximumf %87, %88 : vector<32x32xf32>
    %c2_64 = arith.constant 2 : index
    %c4_65 = arith.constant 4 : index
    %90 = vector.load %arg10[%c2_64, %c4_65] : memref<36x72xf32, #tpu.memory_space<vmem>>, vector<32x32xf32>
    tpu.vector_store %arg10[%c2_64, %c4_65], %89 {strides = array<i32>} : memref<36x72xf32, #tpu.memory_space<vmem>>, vector<32x32xf32>,
    %91 = vector.broadcast %82 : vector<1x32xf32> to vector<32x32xf32>
    %92 = arith.mulf %55, %91 : vector<32x32xf32>
    %93 = vector.broadcast %83 : vector<1x32xf32> to vector<32x32xf32>
    %94 = arith.addf %92, %93 : vector<32x32xf32>
    %cst_66 = arith.constant 0.000000e+00 : f32
    %95 = vector.broadcast %cst_66 : f32 to vector<32x32xf32>
    %96 = arith.maximumf %94, %95 : vector<32x32xf32>
    %c2_67 = arith.constant 2 : index
    %c36 = arith.constant 36 : index
    %97 = vector.load %arg10[%c2_67, %c36] : memref<36x72xf32, #tpu.memory_space<vmem>>, vector<32x32xf32>
    tpu.vector_store %arg10[%c2_67, %c36], %96 {strides = array<i32>} : memref<36x72xf32, #tpu.memory_space<vmem>>, vector<32x32xf32>,
    %cst_68 = arith.constant 0.000000e+00 : f32
    %98 = vector.broadcast %cst_68 : f32 to vector<2x32xf32>
    %cst_69 = arith.constant 0.000000e+00 : f32
    %99 = vector.broadcast %cst_69 : f32 to vector<32x32xf32>
    %c0_70 = arith.constant 0 : index
    %c0_71 = arith.constant 0 : index
    %100 = vector.load %arg10[%c0_70, %c0_71] : memref<36x72xf32, #tpu.memory_space<vmem>>, vector<32x40xf32>
    %101 = arith.truncf %100 : vector<32x40xf32> to vector<32x40xbf16>
    %c0_72 = arith.constant 0 : index
    %c0_73 = arith.constant 0 : index
    %c0_74 = arith.constant 0 : index
    %102 = vector.load %arg4[%c0_72, %c0_73, %c0_74] : memref<3x40x32xbf16, #tpu.memory_space<vmem>>, vector<1x40x32xbf16>
    %103 = vector.shape_cast %102 : vector<1x40x32xbf16> to vector<40x32xbf16>
    %cst_75 = arith.constant dense<0.000000e+00> : vector<32x32xf32>
    %104 = tpu.matmul %101, %103, %cst_75 {dimension_numbers = #tpu.dot_dimension_numbers<[1], [0], [0], [1], [0, 0, 1, 1], [], []>} : vector<32x40xbf16>, vector<40x32xbf16>, vector<32x32xf32> -> vector<32x32xf32>
    %105 = arith.addf %99, %104 : vector<32x32xf32>
    %c2_76 = arith.constant 2 : index
    %c0_77 = arith.constant 0 : index
    %106 = vector.load %arg10[%c2_76, %c0_77] : memref<36x72xf32, #tpu.memory_space<vmem>>, vector<32x40xf32>
    %107 = arith.truncf %106 : vector<32x40xf32> to vector<32x40xbf16>
    %c1_78 = arith.constant 1 : index
    %c0_79 = arith.constant 0 : index
    %c0_80 = arith.constant 0 : index
    %108 = vector.load %arg4[%c1_78, %c0_79, %c0_80] : memref<3x40x32xbf16, #tpu.memory_space<vmem>>, vector<1x40x32xbf16>
    %109 = vector.shape_cast %108 : vector<1x40x32xbf16> to vector<40x32xbf16>
    %cst_81 = arith.constant dense<0.000000e+00> : vector<32x32xf32>
    %110 = tpu.matmul %107, %109, %cst_81 {dimension_numbers = #tpu.dot_dimension_numbers<[1], [0], [0], [1], [0, 0, 1, 1], [], []>} : vector<32x40xbf16>, vector<40x32xbf16>, vector<32x32xf32> -> vector<32x32xf32>
    %111 = arith.addf %105, %110 : vector<32x32xf32>
    %c4_82 = arith.constant 4 : index
    %c0_83 = arith.constant 0 : index
    %112 = vector.load %arg10[%c4_82, %c0_83] : memref<36x72xf32, #tpu.memory_space<vmem>>, vector<32x40xf32>
    %113 = arith.truncf %112 : vector<32x40xf32> to vector<32x40xbf16>
    %c2_84 = arith.constant 2 : index
    %c0_85 = arith.constant 0 : index
    %c0_86 = arith.constant 0 : index
    %114 = vector.load %arg4[%c2_84, %c0_85, %c0_86] : memref<3x40x32xbf16, #tpu.memory_space<vmem>>, vector<1x40x32xbf16>
    %115 = vector.shape_cast %114 : vector<1x40x32xbf16> to vector<40x32xbf16>
    %cst_87 = arith.constant dense<0.000000e+00> : vector<32x32xf32>
    %116 = tpu.matmul %113, %115, %cst_87 {dimension_numbers = #tpu.dot_dimension_numbers<[1], [0], [0], [1], [0, 0, 1, 1], [], []>} : vector<32x40xbf16>, vector<40x32xbf16>, vector<32x32xf32> -> vector<32x32xf32>
    %117 = arith.addf %111, %116 : vector<32x32xf32>
    %cst_88 = arith.constant dense<0.000000e+00> : vector<32xf32>
    %118 = vector.multi_reduction <add>, %117, %cst_88 [0] : vector<32x32xf32> to vector<32xf32>
    %119 = vector.shape_cast %118 : vector<32xf32> to vector<1x32xf32>
    %120 = arith.mulf %117, %117 : vector<32x32xf32>
    %cst_89 = arith.constant dense<0.000000e+00> : vector<32xf32>
    %121 = vector.multi_reduction <add>, %120, %cst_89 [0] : vector<32x32xf32> to vector<32xf32>
    %122 = vector.shape_cast %121 : vector<32xf32> to vector<1x32xf32>
    %123 = tpu.concatenate %119, %122 in 0 : vector<1x32xf32>, vector<1x32xf32> -> vector<2x32xf32>
    %124 = arith.addf %98, %123 : vector<2x32xf32>
    %cst_90 = arith.constant 0.000000e+00 : f32
    %125 = vector.broadcast %cst_90 : f32 to vector<32x32xf32>
    %c0_91 = arith.constant 0 : index
    %c32_92 = arith.constant 32 : index
    %126 = vector.load %arg10[%c0_91, %c32_92] : memref<36x72xf32, #tpu.memory_space<vmem>>, vector<32x40xf32>
    %127 = arith.truncf %126 : vector<32x40xf32> to vector<32x40xbf16>
    %c0_93 = arith.constant 0 : index
    %c0_94 = arith.constant 0 : index
    %c0_95 = arith.constant 0 : index
    %128 = vector.load %arg4[%c0_93, %c0_94, %c0_95] : memref<3x40x32xbf16, #tpu.memory_space<vmem>>, vector<1x40x32xbf16>
    %129 = vector.shape_cast %128 : vector<1x40x32xbf16> to vector<40x32xbf16>
    %cst_96 = arith.constant dense<0.000000e+00> : vector<32x32xf32>
    %130 = tpu.matmul %127, %129, %cst_96 {dimension_numbers = #tpu.dot_dimension_numbers<[1], [0], [0], [1], [0, 0, 1, 1], [], []>} : vector<32x40xbf16>, vector<40x32xbf16>, vector<32x32xf32> -> vector<32x32xf32>
    %131 = arith.addf %125, %130 : vector<32x32xf32>
    %c2_97 = arith.constant 2 : index
    %c32_98 = arith.constant 32 : index
    %132 = vector.load %arg10[%c2_97, %c32_98] : memref<36x72xf32, #tpu.memory_space<vmem>>, vector<32x40xf32>
    %133 = arith.truncf %132 : vector<32x40xf32> to vector<32x40xbf16>
    %c1_99 = arith.constant 1 : index
    %c0_100 = arith.constant 0 : index
    %c0_101 = arith.constant 0 : index
    %134 = vector.load %arg4[%c1_99, %c0_100, %c0_101] : memref<3x40x32xbf16, #tpu.memory_space<vmem>>, vector<1x40x32xbf16>
    %135 = vector.shape_cast %134 : vector<1x40x32xbf16> to vector<40x32xbf16>
    %cst_102 = arith.constant dense<0.000000e+00> : vector<32x32xf32>
    %136 = tpu.matmul %133, %135, %cst_102 {dimension_numbers = #tpu.dot_dimension_numbers<[1], [0], [0], [1], [0, 0, 1, 1], [], []>} : vector<32x40xbf16>, vector<40x32xbf16>, vector<32x32xf32> -> vector<32x32xf32>
    %137 = arith.addf %131, %136 : vector<32x32xf32>
    %c4_103 = arith.constant 4 : index
    %c32_104 = arith.constant 32 : index
    %138 = vector.load %arg10[%c4_103, %c32_104] : memref<36x72xf32, #tpu.memory_space<vmem>>, vector<32x40xf32>
    %139 = arith.truncf %138 : vector<32x40xf32> to vector<32x40xbf16>
    %c2_105 = arith.constant 2 : index
    %c0_106 = arith.constant 0 : index
    %c0_107 = arith.constant 0 : index
    %140 = vector.load %arg4[%c2_105, %c0_106, %c0_107] : memref<3x40x32xbf16, #tpu.memory_space<vmem>>, vector<1x40x32xbf16>
    %141 = vector.shape_cast %140 : vector<1x40x32xbf16> to vector<40x32xbf16>
    %cst_108 = arith.constant dense<0.000000e+00> : vector<32x32xf32>
    %142 = tpu.matmul %139, %141, %cst_108 {dimension_numbers = #tpu.dot_dimension_numbers<[1], [0], [0], [1], [0, 0, 1, 1], [], []>} : vector<32x40xbf16>, vector<40x32xbf16>, vector<32x32xf32> -> vector<32x32xf32>
    %143 = arith.addf %137, %142 : vector<32x32xf32>
    %cst_109 = arith.constant dense<0.000000e+00> : vector<32xf32>
    %144 = vector.multi_reduction <add>, %143, %cst_109 [0] : vector<32x32xf32> to vector<32xf32>
    %145 = vector.shape_cast %144 : vector<32xf32> to vector<1x32xf32>
    %146 = arith.mulf %143, %143 : vector<32x32xf32>
    %cst_110 = arith.constant dense<0.000000e+00> : vector<32xf32>
    %147 = vector.multi_reduction <add>, %146, %cst_110 [0] : vector<32x32xf32> to vector<32xf32>
    %148 = vector.shape_cast %147 : vector<32xf32> to vector<1x32xf32>
    %149 = tpu.concatenate %145, %148 in 0 : vector<1x32xf32>, vector<1x32xf32> -> vector<2x32xf32>
    %150 = arith.addf %124, %149 : vector<2x32xf32>
    %c0_111 = arith.constant 0 : index
    %c0_112 = arith.constant 0 : index
    %151 = vector.load %arg7[%c0_111, %c0_112] : memref<32x4xf32, #tpu.memory_space<vmem>>, vector<32x4xf32>
    %cst_113 = arith.constant dense<0.000000e+00> : vector<2x4xf32>
    %152 = tpu.matmul %150, %151, %cst_113 {dimension_numbers = #tpu.dot_dimension_numbers<[1], [0], [0], [1], [0, 0, 1, 1], [], []>} : vector<2x32xf32>, vector<32x4xf32>, vector<2x4xf32> -> vector<2x4xf32>
    %cst_114 = arith.constant 5.120000e+02 : f32
    %153 = vector.broadcast %cst_114 : f32 to vector<2x4xf32>
    %154 = arith.divf %152, %153 : vector<2x4xf32>
    %155 = vector.extract_strided_slice %154 {offsets = [0, 0], sizes = [1, 4], strides = [1, 1]} : vector<2x4xf32> to vector<1x4xf32>
    %156 = vector.extract_strided_slice %154 {offsets = [1, 0], sizes = [1, 4], strides = [1, 1]} : vector<2x4xf32> to vector<1x4xf32>
    %157 = arith.mulf %155, %155 : vector<1x4xf32>
    %158 = arith.subf %156, %157 : vector<1x4xf32>
    %cst_115 = arith.constant 9.99999974E-6 : f32
    %159 = vector.broadcast %cst_115 : f32 to vector<1x4xf32>
    %160 = arith.addf %158, %159 : vector<1x4xf32>
    %161 = math.rsqrt %160 : vector<1x4xf32>
    %c0_116 = arith.constant 0 : index
    %c0_117 = arith.constant 0 : index
    %162 = vector.load %arg5[%c0_116, %c0_117] : memref<1x4xf32, #tpu.memory_space<vmem>>, vector<1x4xf32>
    %163 = arith.mulf %162, %161 : vector<1x4xf32>
    %c0_118 = arith.constant 0 : index
    %c0_119 = arith.constant 0 : index
    %164 = vector.load %arg6[%c0_118, %c0_119] : memref<1x4xf32, #tpu.memory_space<vmem>>, vector<1x4xf32>
    %165 = arith.mulf %155, %163 : vector<1x4xf32>
    %166 = arith.subf %164, %165 : vector<1x4xf32>
    %167 = tpu.concatenate %163, %166 in 0 : vector<1x4xf32>, vector<1x4xf32> -> vector<2x4xf32>
    %c0_120 = arith.constant 0 : index
    %c0_121 = arith.constant 0 : index
    %168 = vector.load %arg8[%c0_120, %c0_121] : memref<4x32xf32, #tpu.memory_space<vmem>>, vector<4x32xf32>
    %cst_122 = arith.constant dense<0.000000e+00> : vector<2x32xf32>
    %169 = tpu.matmul %167, %168, %cst_122 {dimension_numbers = #tpu.dot_dimension_numbers<[1], [0], [0], [1], [0, 0, 1, 1], [], []>} : vector<2x4xf32>, vector<4x32xf32>, vector<2x32xf32> -> vector<2x32xf32>
    %170 = vector.extract_strided_slice %169 {offsets = [0, 0], sizes = [1, 32], strides = [1, 1]} : vector<2x32xf32> to vector<1x32xf32>
    %171 = vector.extract_strided_slice %169 {offsets = [1, 0], sizes = [1, 32], strides = [1, 1]} : vector<2x32xf32> to vector<1x32xf32>
    %172 = vector.broadcast %170 : vector<1x32xf32> to vector<32x32xf32>
    %173 = arith.mulf %117, %172 : vector<32x32xf32>
    %174 = vector.broadcast %171 : vector<1x32xf32> to vector<32x32xf32>
    %175 = arith.addf %173, %174 : vector<32x32xf32>
    %c0_123 = arith.constant 0 : index
    %c0_124 = arith.constant 0 : index
    %176 = vector.load %arg0[%c0_123, %c0_124] : memref<32x64xf32, #tpu.memory_space<vmem>>, vector<32x32xf32>
    %177 = arith.addf %175, %176 : vector<32x32xf32>
    %cst_125 = arith.constant 0.000000e+00 : f32
    %178 = vector.broadcast %cst_125 : f32 to vector<32x32xf32>
    %179 = arith.maximumf %177, %178 : vector<32x32xf32>
    %c0_126 = arith.constant 0 : index
    %c0_127 = arith.constant 0 : index
    %180 = vector.load %arg9[%c0_126, %c0_127] : memref<32x64xf32, #tpu.memory_space<vmem>>, vector<32x32xf32>
    tpu.vector_store %arg9[%c0_126, %c0_127], %179 {strides = array<i32>} : memref<32x64xf32, #tpu.memory_space<vmem>>, vector<32x32xf32>,
    %181 = vector.broadcast %170 : vector<1x32xf32> to vector<32x32xf32>
    %182 = arith.mulf %143, %181 : vector<32x32xf32>
    %183 = vector.broadcast %171 : vector<1x32xf32> to vector<32x32xf32>
    %184 = arith.addf %182, %183 : vector<32x32xf32>
    %c0_128 = arith.constant 0 : index
    %c32_129 = arith.constant 32 : index
    %185 = vector.load %arg0[%c0_128, %c32_129] : memref<32x64xf32, #tpu.memory_space<vmem>>, vector<32x32xf32>
    %186 = arith.addf %184, %185 : vector<32x32xf32>
    %cst_130 = arith.constant 0.000000e+00 : f32
    %187 = vector.broadcast %cst_130 : f32 to vector<32x32xf32>
    %188 = arith.maximumf %186, %187 : vector<32x32xf32>
    %c0_131 = arith.constant 0 : index
    %c32_132 = arith.constant 32 : index
    %189 = vector.load %arg9[%c0_131, %c32_132] : memref<32x64xf32, #tpu.memory_space<vmem>>, vector<32x32xf32>
    tpu.vector_store %arg9[%c0_131, %c32_132], %188 {strides = array<i32>} : memref<32x64xf32, #tpu.memory_space<vmem>>, vector<32x32xf32>,
    return
  }
}

</mosaic_0001>

<bundles_post_ra>
// kernel: tile.9
= control target key start
LH: loop header
LB: loop body
LE: loop exit
PB: predicated region body
PF: predicated region fallthrough
CT: control target
= control target key end

     0   :  { %s67_s8 = smov 28   ;;  %s68_s11 = smov 20   ;;  %vm3_vm0 = vcmask 31744   ;;  %vm9_vm1 = vcmask 261344   ;;  %vm15_vm2 = vcmask 228544   ;;  %vm21_vm3 = vcmask 195744   ;;  %s111_s0 = inlined_call_operand.vmem [shape: f32[8,4,4], index: 0, kind: input, shape index: {}]   ;;  %s112_s1 = inlined_call_operand.vmem [shape: f32[32,4], index: 1, kind: output, shape index: {}]  }
   0x1   :  { %v53_v0 = vld [vmem:[%s111_s0 + $0x7] ss:$8 sm:$0xf]   ;;  %v55_v1 = vld [vmem:[%s111_s0 + $0x5] ss:$8 sm:$0xf]  }
   0x2   :  { %7 = vrot.lane.b32.xlu0 %v53_v0, %s67_s8  ;;  %19 = vrot.lane.b32.xlu1 %v55_v1, %s68_s11  ;;  %v54_v2 = vld [vmem:[%s111_s0 + $0x6] ss:$8 sm:$0xf]   ;;  %v56_v3 = vld [vmem:[%s111_s0 + $0x4] ss:$8 sm:$0xf]  }
   0x3   :  { %s69_s16 = smov 24   ;;  %v2_v4 = vld [vmem:[%s111_s0] ss:$8 sm:$0xf]   ;;  %s70_s19 = smov 16   ;;  %vm27_vm4 = vcmask 162944  }
   0x4   :  { %v57_v5 = vld [vmem:[%s111_s0 + $0x3] ss:$8 sm:$0xf]   ;;  %4 = vst.msk [vmem:[#allocation0] sm:$0xf] %vm3_vm0, %v2_v4   ;;  %s71_s24 = smov 12  }
   0x5   :  { %v58_v6 = vld [vmem:[%s111_s0 + $0x2] ss:$8 sm:$0xf]   ;;  %s72_s25 = smov 8   ;;  %vm33_vm5 = vcmask 130144   ;;  %vm39_vm6 = vcmask 97344  }
   0x6   :  { %13 = vrot.lane.b32.xlu0 %v54_v2, %s69_s16  ;;  %25 = vrot.lane.b32.xlu1 %v56_v3, %s70_s19  ;;  %v59_v7 = vld [vmem:[%s111_s0 + $0x1] ss:$8 sm:$0xf]   ;;  %s73_s0 = smov 4   ;;  %vm45_vm7 = vcmask 64544  }
   0xa   :  { %31 = vrot.lane.b32.xlu0 %v57_v5, %s71_s24  ;;  %37 = vrot.lane.b32.xlu1 %v58_v6, %s72_s25 }
   0xe   :  { %43 = vrot.lane.b32.xlu0 %v59_v7, %s73_s0 }
  0x74   :  { %v8_v8 = vpop.permute.xlu0 %7   ;;  %v20_v9 = vpop.permute.xlu1 %19  }
  0x75   :  { %10 = vst.msk [vmem:[#allocation0] sm:$0xf] %vm9_vm1, %v8_v8  }
  0x78   :  { %v14_v10 = vpop.permute.xlu0 %13   ;;  %v26_v11 = vpop.permute.xlu1 %25  }
  0x79   :  { %16 = vst.msk [vmem:[#allocation0] sm:$0xf] %vm15_vm2, %v14_v10  }
  0x7a   :  { %22 = vst.msk [vmem:[#allocation0] sm:$0xf] %vm21_vm3, %v20_v9  }
  0x7b   :  { %28 = vst.msk [vmem:[#allocation0] sm:$0xf] %vm27_vm4, %v26_v11  }
  0x7c   :  { %v32_v12 = vpop.permute.xlu0 %31   ;;  %v38_v13 = vpop.permute.xlu1 %37  }
  0x7d   :  { %34 = vst.msk [vmem:[#allocation0] sm:$0xf] %vm33_vm5, %v32_v12  }
  0x7e   :  { %40 = vst.msk [vmem:[#allocation0] sm:$0xf] %vm39_vm6, %v38_v13  }
  0x80   :  { %v44_v14 = vpop.permute.xlu0 %43  }
  0x81   :  { %46 = vst.msk [vmem:[#allocation0] sm:$0xf] %vm45_vm7, %v44_v14  }
  0x88   :  { %v50_v15 = vld [vmem:[#allocation0] sm:$0xf] }
  0x89   :  { %52 = vst [vmem:[%s112_s1] sm:$0xf] %v50_v15 }

// kernel: basic_block_forward.1
= control target key start
LH: loop header
LB: loop body
LE: loop exit
PB: predicated region body
PF: predicated region fallthrough
CT: control target
= control target key end

     0   :  { %vm36_vm0 = vcmask 31744   ;;  %vm43_vm1 = vcmask 589344   ;;  %v2027_v3 = vmov 0.0   ;;  %vm33_vm2 = vcmask 582656   ;;  %s2028_s15 = smov 4   ;;  %s2029_s26 = smov 96   ;;  %s2502_s0 = inlined_call_operand.vmem [shape: f32[32,64], index: 0, kind: input, shape index: {}]   ;;  %s2503_s1 = inlined_call_operand.vmem [shape: bf16[3,40,32], index: 1, kind: input, shape index: {}]   ;;  %s2504_s7 = inlined_call_operand.vmem [shape: f32[32,4], index: 7, kind: input, shape index: {}]   ;;  %s2505_s8 = inlined_call_operand.vmem [shape: f32[4,32], index: 8, kind: input, shape index: {}]   ;;  %s2506_s2 = inlined_call_operand.vmem [shape: f32[1,4], index: 2, kind: input, shape index: {}]   ;;  %s2507_s3 = inlined_call_operand.vmem [shape: f32[1,4], index: 3, kind: input, shape index: {}]   ;;  %s2508_s4 = inlined_call_operand.vmem [shape: bf16[3,40,32], index: 4, kind: input, shape index: {}]   ;;  %s2509_s5 = inlined_call_operand.vmem [shape: f32[1,4], index: 5, kind: input, shape index: {}]   ;;  %s2510_s6 = inlined_call_operand.vmem [shape: f32[1,4], index: 6, kind: input, shape index: {}]   ;;  %s2511_s9 = inlined_call_operand.vmem [shape: f32[32,64], index: 9, kind: output, shape index: {}]  }
   0x1   :  { %v52_v0 = vld [vmem:[%s2502_s0 + $0x10] sm:$0xff]  ;;  %v50_v1 = vld [vmem:[%s2502_s0] sm:$0xff]  ;;  %v53_v2 = vld [vmem:[%s2502_s0 + $0x18] sm:$0xff]  ;;  %39 = vst.msk [vmem:[#allocation2 + $0x10] sm:$0xff] %vm36_vm0, %v2027_v3  ;;  %vm41_vm3 = vcmask 27648   ;;  %vm48_vm4 = vcmask 585248  }
   0x2   :  { %40 = vst.msk [vmem:[#allocation2 + $0x18] sm:$0xff] %vm36_vm0, %v2027_v3  ;;  %38 = vst.msk [vmem:[#allocation2 + $0x8] sm:$0xff] %vm36_vm0, %v2027_v3  ;;  %62 = vrot.lane.b32.xlu1 %v52_v0, %s2028_s15  ;;  %58 = vrot.lane.b32.xlu0 %v50_v1, %s2028_s15  ;;  %v51_v4 = vld [vmem:[%s2502_s0 + $0x8] sm:$0xff]  ;;  %v2005_v5 = vld [vmem:[%s2503_s1 + $0x14] sm:$0xff]   ;;  %vm120_vm5 = vcmask 1043456   ;;  %vm70_vm6 = vcmask 556064  }
   0x3   :  { %46 = vst.msk [vmem:[#allocation2 + $0x10] sm:$0xff] %vm43_vm1, %v2027_v3  ;;  %47 = vst.msk [vmem:[#allocation2 + $0x18] sm:$0xff] %vm43_vm1, %v2027_v3  ;;  %v2006_v6 = vld [vmem:[%s2503_s1 + $0x1c] sm:$0xff]   ;;  %1789 = vmatprep.subr.bf16.mxu0 %v2005_v5  ;;  %1819 = vmatprep.subr.bf16.mxu1 %v2005_v5  ;;  %v2007_v7 = vld [vmem:[%s2503_s1 + $0x24] ss:$0 sps:$4 sm:$0xff]   ;;  %vm113_vm7 = vcmask 326656  }
   0x4   :  { %34 = vst.msk [vmem:[#allocation2] sm:$0x3] %vm33_vm2, %v2027_v3  ;;  %35 = vst.msk [vmem:[#allocation2 + $0x22] sm:$0x3] %vm33_vm2, %v2027_v3  ;;  %1790 = vmatpush3.bf16.msra.mxu0 %v2005_v5  ;;  %1820 = vmatpush3.bf16.msra.mxu1 %v2005_v5  ;;  %v122_v8 = vsel %vm120_vm5, %v2007_v7, 0  ;;  %v2135_v9 = vld [vmem:[%s2503_s1] sm:$0xff]  }
   0x5   :  { %45 = vst.msk [vmem:[#allocation2 + $0x8] sm:$0xff] %vm43_vm1, %v2027_v3  ;;  %1791 = vmatprep.subr.bf16.mxu0 %v2006_v6  ;;  %1821 = vmatprep.subr.bf16.mxu1 %v2006_v6  ;;  %v2009_v25 = vld [vmem:[%s2503_s1 + $0x8] sm:$0xff]   ;;  %v2010_v31 = vld [vmem:[%s2503_s1 + $0x10] ss:$0 sps:$4 sm:$0xff]   ;;  %v2013_v37 = vld [vmem:[%s2503_s1 + $0x38] ss:$0 sps:$4 sm:$0xff]  }
   0x6   :  { %37 = vst.msk [vmem:[#allocation2] sm:$0xff] %vm36_vm0, %v2027_v3  ;;  %64 = vrot.lane.b32.xlu1 %v53_v2, %s2028_s15  ;;  %60 = vrot.lane.b32.xlu0 %v51_v4, %s2028_s15  ;;  %v195_v34 = vsel %vm120_vm5, %v2010_v31, 0  ;;  %v2011_v35 = vld [vmem:[%s2503_s1 + $0x28] sm:$0xff]   ;;  %v2012_v36 = vld [vmem:[%s2503_s1 + $0x30] sm:$0xff]   ;;  %v280_v38 = vsel %vm120_vm5, %v2013_v37, 0  ;;  %vm335_vm8 = vcmask 261120  }
   0x7   :  { %42 = vst.msk [vmem:[#allocation2 + $0x20] sm:$0xf] %vm41_vm3, %v2027_v3  ;;  %v588_v59 = vld [vmem:[%s2504_s7] sm:$0xff]  ;;  %v589_v60 = vld [vmem:[%s2504_s7 + $0x8] sm:$0xff]  ;;  %v2030_v2 = vmov 0.0|0.0   ;;  %vm2031_vm9 = vmmov 0  }
   0x8   :  { %44 = vst.msk [vmem:[#allocation2] sm:$0xff] %vm43_vm1, %v2027_v3  ;;  %1792 = vmatpush3.bf16.msra.mxu0 %v2006_v6  ;;  %1822 = vmatpush3.bf16.msra.mxu1 %v2006_v6  ;;  %v2212_v63 = vpack.c.bf16 %v589_v60, %v588_v59  ;;  %v590_v6 = vld [vmem:[%s2504_s7 + $0x10] sm:$0xff]  ;;  %vm366_vm10 = vcmask 1040384   ;;  %s2033_s16 = smov 36   ;;  %vm816_vm11 = vcmask 293920   ;;  %vm849_vm12 = vcmask 556320  }
   0x9   :  { %49 = vst.msk [vmem:[#allocation2 + $0x20] sm:$0xf] %vm48_vm4, %v2027_v3  ;;  %1985 = vmatprep.subr.msk.bf16.mxu0 %vm120_vm5, %v2007_v7  ;;  %1988 = vmatprep.subr.msk.bf16.mxu1 %vm120_vm5, %v2007_v7  ;;  %v591_v7 = vld [vmem:[%s2504_s7 + $0x18] sm:$0xff]  ;;  %vm1638_vm13 = vcmask 523520  }
   0xc   :  { %1794 = vmatpush3.bf16.msra.mxu0 %v122_v8  ;;  %1824 = vmatpush3.bf16.msra.mxu1 %v122_v8 }
   0xd   :  { %1799 = vmatprep.subr.bf16.mxu0 %v2135_v9  ;;  %1829 = vmatprep.subr.bf16.mxu1 %v2135_v9 }
  0x74   :  { %v63_v10 = vpop.permute.xlu1 %62  ;;  %v59_v11 = vpop.permute.xlu0 %58 }
  0x75   :  { %73 = vst.msk [vmem:[#allocation2 + $0x12] sm:$0xff] %vm70_vm6, %v63_v10  ;;  %71 = vst.msk [vmem:[#allocation2 + $0x2] sm:$0xff] %vm70_vm6, %v59_v11 }
  0x78   :  { %v65_v12 = vpop.permute.xlu1 %64  ;;  %v61_v13 = vpop.permute.xlu0 %60 }
  0x79   :  { %74 = vst.msk [vmem:[#allocation2 + $0x1a] sm:$0xff] %vm70_vm6, %v65_v12  ;;  %72 = vst.msk [vmem:[#allocation2 + $0xa] sm:$0xff] %vm70_vm6, %v61_v13 }
  0x7c   :  { %v88_v14 = vld [vmem:[#allocation2 + $0x12] sm:$0xff]  ;;  %v86_v16 = vld [vmem:[#allocation2 + $0x2] sm:$0xff] }
  0x7d   :  { %v75_v23 = vld [vmem:[#allocation2] sm:$0xff] }
  0x80   :  { %v89_v15 = vld [vmem:[#allocation2 + $0x1a] sm:$0xff]  ;;  %v87_v17 = vld [vmem:[#allocation2 + $0xa] sm:$0xff] }
  0x81   :  { %v91_v18 = vpack.c.bf16 %v89_v15, %v88_v14  ;;  %v90_v19 = vpack.c.bf16 %v87_v17, %v86_v16  ;;  %v76_v20 = vld [vmem:[#allocation2 + $0x8] sm:$0xff]  ;;  %v77_v21 = vld [vmem:[#allocation2 + $0x10] sm:$0xff]  ;;  %v78_v22 = vld [vmem:[#allocation2 + $0x18] sm:$0xff] }
  0x82   :  { %v79_v24 = vpack.c.bf16 %v76_v20, %v75_v23  ;;  %v80_v26 = vpack.c.bf16 %v78_v22, %v77_v21  ;;  %v248_v27 = vld [vmem:[#allocation2 + $0x14] sm:$0xff]  ;;  %v249_v28 = vld [vmem:[#allocation2 + $0x1c] sm:$0xff]  ;;  %v246_v29 = vld [vmem:[#allocation2 + $0x4] sm:$0xff] }
  0x83   :  { %373 = vrot.lane.b32.xlu1 %v91_v18, %s2029_s26  ;;  %371 = vrot.lane.b32.xlu0 %v90_v19, %s2029_s26  ;;  %v247_v30 = vld [vmem:[#allocation2 + $0xc] sm:$0xff]  ;;  %v251_v32 = vpack.c.bf16 %v249_v28, %v248_v27 }
  0x84   :  { %1795 = vmatprep.mubr.msk.bf16.mxu0 %vm113_vm7, %v90_v19  ;;  %v250_v33 = vpack.c.bf16 %v247_v30, %v246_v29 }
  0x85   :  { %1796 = vmatmul.mubr.msk.bf16.vlgmr.msra.gmra.mrb[0].mxu0 %vm113_vm7, %v91_v18 }
  0x86   :  { %1800 = vmatpush3.bf16.msra.mxu0 %v2135_v9  ;;  %1805 = vmatprep.mubr.msk.bf16.mxu0 %vm113_vm7, %v79_v24 }
  0x87   :  { %434 = vrot.lane.b32.xlu1 %v80_v26, %s2029_s26  ;;  %432 = vrot.lane.b32.xlu0 %v79_v24, %s2029_s26 }
  0x88   :  { %1801 = vmatprep.subr.bf16.mxu0 %v2009_v25 }
  0x8a   :  { %1802 = vmatpush3.bf16.msra.mxu0 %v2009_v25 }
  0x8b   :  { %495 = vrot.lane.b32.xlu1 %v251_v32, %s2029_s26  ;;  %493 = vrot.lane.b32.xlu0 %v250_v33, %s2029_s26 }
  0x8c   :  { %1986 = vmatprep.subr.msk.bf16.mxu0 %vm120_vm5, %v2010_v31 }
  0x8e   :  { %1804 = vmatpush3.bf16.msra.mxu0 %v195_v34 }
  0x8f   :  { %1809 = vmatprep.subr.bf16.mxu0 %v2011_v35 }
  0x91   :  { %1806 = vmatmul.mubr.msk.bf16.vlgmr.msra.gmra.mrb[0].mxu0 %vm113_vm7, %v80_v26 }
  0x92   :  { %1810 = vmatpush3.bf16.msra.mxu0 %v2011_v35  ;;  %1815 = vmatprep.mubr.msk.bf16.mxu0 %vm113_vm7, %v250_v33 }
  0x93   :  { %1811 = vmatprep.subr.bf16.mxu0 %v2012_v36 }
  0x96   :  { %1812 = vmatpush3.bf16.msra.mxu0 %v2012_v36 }
  0x97   :  { %1987 = vmatprep.subr.msk.bf16.mxu0 %vm120_vm5, %v2013_v37 }
  0x9a   :  { %1814 = vmatpush3.bf16.msra.mxu0 %v280_v38 }
  0x9b   :  { %1941 = vmatprep.subr.bf16.mxu0 %v2030_v2 }
  0x9d   :  { %1816 = vmatmul.mubr.msk.bf16.vlgmr.msra.gmra.mrb[0].mxu0 %vm113_vm7, %v251_v32 }
  0x9e   :  { %1943 = vmatpush3.bf16.msra.mxu0 %v2212_v63  ;;  %1857 = vmatprep.mubr.msk.f32.mxu0 %vm2031_vm9, %v2027_v3 }
  0x9f   :  { %1944 = vmatprep.subr.bf16.mxu0 %v2030_v2 }
  0xf5   :  { %v374_v39 = vpop.permute.xlu1 %373  ;;  %v372_v40 = vpop.permute.xlu0 %371 }
  0xf6   :  { %1825 = vmatprep.mubr.msk.bf16.mxu1 %vm113_vm7, %v372_v40 }
  0xf7   :  { %1826 = vmatmul.mubr.msk.bf16.vlgmr.msra.gmra.mrb[0].mxu1 %vm113_vm7, %v374_v39 }
  0xf8   :  { %1830 = vmatpush3.bf16.msra.mxu1 %v2135_v9  ;;  %v2227_v9 = vpack.c.bf16 %v591_v7, %v590_v6 }
  0xf9   :  { %v433_v41 = vpop.permute.xlu0 %432  ;;  %1831 = vmatprep.subr.bf16.mxu1 %v2009_v25  ;;  %v435_v42 = vpop.permute.xlu1 %434 }
  0xfa   :  { %1835 = vmatprep.mubr.msk.bf16.mxu1 %vm113_vm7, %v433_v41  ;;  %1946 = vmatpush3.bf16.msra.mxu0 %v2227_v9 }
  0xfc   :  { %1832 = vmatpush3.bf16.msra.mxu1 %v2009_v25 }
  0xfd   :  { %1989 = vmatprep.subr.msk.bf16.mxu1 %vm120_vm5, %v2010_v31  ;;  %v494_v43 = vpop.permute.xlu0 %493  ;;  %v496_v44 = vpop.permute.xlu1 %495 }
 0x100   :  { %1834 = vmatpush3.bf16.msra.mxu1 %v195_v34 }
 0x101   :  { %1839 = vmatprep.subr.bf16.mxu1 %v2011_v35 }
 0x103   :  { %1836 = vmatmul.mubr.msk.bf16.vlgmr.msra.gmra.mrb[0].mxu1 %vm113_vm7, %v435_v42 }
 0x104   :  { %1840 = vmatpush3.bf16.msra.mxu1 %v2011_v35  ;;  %1845 = vmatprep.mubr.msk.bf16.mxu1 %vm113_vm7, %v494_v43 }
 0x105   :  { %1841 = vmatprep.subr.bf16.mxu1 %v2012_v36 }
 0x108   :  { %1842 = vmatpush3.bf16.msra.mxu1 %v2012_v36 }
 0x109   :  { %1990 = vmatprep.subr.msk.bf16.mxu1 %vm120_vm5, %v2013_v37 }
 0x10c   :  { %1844 = vmatpush3.bf16.msra.mxu1 %v280_v38 }
 0x10d   :  { %1860 = vmatprep.subr.mxu1 %v2027_v3 }
 0x10f   :  { %1846 = vmatmul.mubr.msk.bf16.vlgmr.msra.gmra.mrb[0].mxu1 %vm113_vm7, %v496_v44 }
 0x110   :  { %1862 = vmatprep.mubr.msk.f32.mxu1 %vm2031_vm9, %v2027_v3 }
 0x170   :  { %v2182_v45 = vpop.f32.mrb[0].mxu0 }
 0x171   :  { %v2184_v46 = vpop.f32.mrb[1].mxu0  ;;  %v351_v50 = vmul.f32 %v2182_v45, %v2182_v45  ;;  %v339_v55 = vsel %vm335_vm8, %v2182_v45, 0.0 }
 0x172   :  { %v349_v47 = vmul.f32 %v2184_v46, %v2184_v46  ;;  %v2188_v48 = vpop.f32.mrb[2].mxu0  ;;  %v336_v51 = vsel %vm335_vm8, %v2184_v46, 0.0 }
 0x173   :  { %v2190_v49 = vpop.f32.mrb[3].mxu0  ;;  %v352_v57 = vmul.f32 %v2188_v48, %v2188_v48  ;;  %v356_v0 = vsel %vm335_vm8, %v351_v50, 0.0  ;;  %v341_v1 = vsel %vm335_vm8, %v2188_v48, 0.0 }
 0x174   :  { %v337_v52 = vsel %vm335_vm8, %v2190_v49, 0.0  ;;  %v350_v53 = vmul.f32 %v2190_v49, %v2190_v49  ;;  %v353_v56 = vsel %vm335_vm8, %v349_v47, 0.0 }
 0x175   :  { %v338_v54 = vadd.f32 %v337_v52, %v336_v51  ;;  %v358_v8 = vsel %vm335_vm8, %v352_v57, 0.0 }
 0x176   :  { %v354_v58 = vsel %vm335_vm8, %v350_v53, 0.0 }
 0x177   :  { %v340_v61 = vadd.f32 %v339_v55, %v338_v54  ;;  %v355_v62 = vadd.f32 %v354_v58, %v353_v56 }
 0x179   :  { %v342_v4 = vadd.f32 %v341_v1, %v340_v61  ;;  %v357_v5 = vadd.f32 %v356_v0, %v355_v62  ;;  %v703_v1 = vld [vmem:[%s2505_s8] sm:$0xf] }
 0x17a   :  { %1861 = vmatpush3.msk.msra.mxu1 %vm120_vm5, %v703_v1 }
 0x17b   :  { %v343_v10 = vrot.slane %v342_v4, 4  ;;  %v359_v11 = vadd.f32 %v358_v8, %v357_v5 }
 0x17d   :  { %v344_v12 = vadd.f32 %v343_v10, %v342_v4  ;;  %v360_v13 = vrot.slane %v359_v11, 4 }
 0x17f   :  { %v345_v14 = vrot.slane %v344_v12, 2  ;;  %v361_v15 = vadd.f32 %v360_v13, %v359_v11 }
 0x181   :  { %v346_v16 = vadd.f32 %v345_v14, %v344_v12  ;;  %v362_v17 = vrot.slane %v361_v15, 2  ;;  %v2032_v12 = vmov 1966171168   ;;  %v679_v14 = vlaneseq }
 0x182   :  { %v677_v13 = vunpack.c.l.s4 %v2032_v12 }
 0x183   :  { %v347_v18 = vrot.slane %v346_v16, 1  ;;  %v363_v19 = vadd.f32 %v362_v17, %v361_v15 }
 0x184   :  { %v678_v15 = vunpack.c.0.s8 %v677_v13 }
 0x185   :  { %v364_v20 = vrot.slane %v363_v19, 1  ;;  %v348_v21 = vadd.f32 %v347_v18, %v346_v16  ;;  %v2269_v16 = vshrl.u32 %v679_v14, 7 }
 0x187   :  { %v365_v22 = vadd.f32 %v364_v20, %v363_v19  ;;  %v2272_v17 = vsub.s32 %v678_v15, %v2269_v16 }
 0x189   :  { %v367_v23 = vsel %vm366_vm10, %v348_v21, %v365_v22  ;;  %v674_v21 = vld [vmem:[%s2506_s2] sm:$0x1] }
 0x1e2   :  { %v2235_v24 = vpop.f32.mrb[0].mxu1 }
 0x1e3   :  { %v2237_v25 = vpop.f32.mrb[1].mxu1  ;;  %v571_v29 = vmul.f32 %v2235_v24, %v2235_v24  ;;  %v559_v34 = vsel %vm335_vm8, %v2235_v24, 0.0 }
 0x1e4   :  { %v569_v26 = vmul.f32 %v2237_v25, %v2237_v25  ;;  %v2241_v27 = vpop.f32.mrb[2].mxu1  ;;  %v556_v30 = vsel %vm335_vm8, %v2237_v25, 0.0 }
 0x1e5   :  { %v2243_v28 = vpop.f32.mrb[3].mxu1  ;;  %v572_v36 = vmul.f32 %v2241_v27, %v2241_v27  ;;  %v576_v40 = vsel %vm335_vm8, %v571_v29, 0.0  ;;  %v561_v41 = vsel %vm335_vm8, %v2241_v27, 0.0 }
 0x1e6   :  { %v557_v31 = vsel %vm335_vm8, %v2243_v28, 0.0  ;;  %v570_v32 = vmul.f32 %v2243_v28, %v2243_v28  ;;  %v573_v35 = vsel %vm335_vm8, %v569_v26, 0.0  ;;  %v693_v26 = vld [vmem:[%s2507_s3] sm:$0x1] }
 0x1e7   :  { %v558_v33 = vadd.f32 %v557_v31, %v556_v30  ;;  %v578_v44 = vsel %vm335_vm8, %v572_v36, 0.0  ;;  %v2283_v30 = vsub.s32 0, %v2269_v16 }
 0x1e8   :  { %v574_v37 = vsel %vm335_vm8, %v570_v32, 0.0 }
 0x1e9   :  { %v560_v38 = vadd.f32 %v559_v34, %v558_v33  ;;  %v575_v39 = vadd.f32 %v574_v37, %v573_v35  ;;  %v790_v34 = vsub.s32 1, %v2269_v16 }
 0x1eb   :  { %v562_v42 = vadd.f32 %v561_v41, %v560_v38  ;;  %v577_v43 = vadd.f32 %v576_v40, %v575_v39 }
 0x1ed   :  { %v563_v47 = vrot.slane %v562_v42, 4  ;;  %v579_v50 = vadd.f32 %v578_v44, %v577_v43 }
 0x1ef   :  { %v564_v51 = vadd.f32 %v563_v47, %v562_v42  ;;  %v580_v52 = vrot.slane %v579_v50, 4 }
 0x1f1   :  { %v565_v53 = vrot.slane %v564_v51, 2  ;;  %v581_v54 = vadd.f32 %v580_v52, %v579_v50 }
 0x1f3   :  { %v566_v55 = vadd.f32 %v565_v53, %v564_v51  ;;  %v582_v56 = vrot.slane %v581_v54, 2 }
 0x1f5   :  { %v567_v57 = vrot.slane %v566_v55, 1  ;;  %v583_v58 = vadd.f32 %v582_v56, %v581_v54 }
 0x1f7   :  { %v584_v59 = vrot.slane %v583_v58, 1  ;;  %v568_v60 = vadd.f32 %v567_v57, %v566_v55  ;;  %v2016_v57 = vld [vmem:[%s2508_s4 + $0x24] ss:$0 sps:$4 sm:$0xff]  }
 0x1f9   :  { %v585_v61 = vadd.f32 %v584_v59, %v583_v58  ;;  %v899_v58 = vsel %vm120_vm5, %v2016_v57, 0  ;;  %v2318_v59 = vld [vmem:[%s2508_s4] sm:$0xff]  }
 0x1fb   :  { %v586_v62 = vsel %vm366_vm10, %v568_v60, %v585_v61 }
 0x1fc   :  { %v587_v0 = vadd.f32 %v586_v62, %v367_v23 }
 0x1fe   :  { %1858 = vmatmul.mubr.msk.f32.vlgmr.msra.gmra.mrb[4].mxu0 %vm335_vm8, %v587_v0 }
 0x2d1   :  { %v661_v4 = vpop.f32.mrb[4].mxu0 }
 0x2d2   :  { %v666_v5 = vmul.f32 0.001953125, %v661_v4  ;;  %v1859_v6 = vpop.f32.mrb[5].mxu0 }
 0x2d4   :  { %v667_v7 = vmul.f32 %v666_v5, %v666_v5 }
 0x2d6   :  { %v669_v8 = vrot.slane %v667_v7, 7 }
 0x2d8   :  { %v671_v10 = vsub.f32 %v666_v5, %v669_v8 }
 0x2da   :  { %v672_v11 = vadd.f32 1e-05, %v671_v10 }
 0x2dc   :  { %2023 = vrsqrt.f32 %v672_v11 }
 0x2e6   :  { %v2024_v18 = vpop.eup %2023 }
 0x2e7   :  { %v682_v19 = vrot.slane %v2024_v18, %v2272_v17 }
 0x2e9   :  { %v683_v20 = vcombine.high %v682_v19, %v682_v19 }
 0x2eb   :  { %v690_v22 = vrot.slane %v683_v20, %v2272_v17 }
 0x2ed   :  { %v692_v23 = vmul.f32 %v690_v22, %v674_v21 }
 0x2ef   :  { %v694_v29 = vmul.f32 %v692_v23, %v666_v5 }
 0x2f1   :  { %v695_v31 = vsub.f32 %v693_v26, %v694_v29 }
 0x2f3   :  { %v700_v32 = vrot.slane %v695_v31, %v2283_v30 }
 0x2f5   :  { %v702_v33 = vsel %vm366_vm10, %v692_v23, %v700_v32  ;;  %v2018_v23 = vld [vmem:[%s2508_s4 + $0x8] sm:$0xff]  }
 0x2f6   :  { %1863 = vmatmul.mubr.msk.f32.vlgmr.msra.gmra.mrb[4].mxu1 %vm36_vm0, %v702_v33 }
 0x3c9   :  { %v776_v35 = vpop.f32.mrb[4].mxu1 }
 0x3ca   :  { %v783_v36 = vrot.slane %v776_v35, %v2283_v30  ;;  %v1864_v37 = vpop.f32.mrb[5].mxu1  ;;  %v791_v38 = vrot.slane %v776_v35, %v790_v34 }
 0x3cc   :  { %v785_v39 = vmul.f32 %v783_v36, %v2190_v49  ;;  %v784_v40 = vmul.f32 %v783_v36, %v2184_v46  ;;  %v787_v41 = vmul.f32 %v2188_v48, %v783_v36  ;;  %v786_v42 = vmul.f32 %v2182_v45, %v783_v36  ;;  %v2014_v46 = vld [vmem:[%s2508_s4 + $0x14] sm:$0xff]  }
 0x3cd   :  { %v822_v43 = vmul.f32 %v783_v36, %v2243_v28  ;;  %v821_v44 = vmul.f32 %v783_v36, %v2237_v25  ;;  %v824_v47 = vmul.f32 %v2241_v27, %v783_v36  ;;  %v823_v50 = vmul.f32 %v2235_v24, %v783_v36  ;;  %1865 = vmatprep.subr.bf16.mxu0 %v2014_v46  ;;  %v2015_v24 = vld [vmem:[%s2508_s4 + $0x1c] sm:$0xff]   ;;  %v2019_v36 = vld [vmem:[%s2508_s4 + $0x10] ss:$0 sps:$4 sm:$0xff]  }
 0x3ce   :  { %v793_v51 = vadd.f32 %v791_v38, %v785_v39  ;;  %v792_v52 = vadd.f32 %v791_v38, %v784_v40  ;;  %v795_v53 = vadd.f32 %v791_v38, %v787_v41  ;;  %v794_v54 = vadd.f32 %v791_v38, %v786_v42  ;;  %1895 = vmatprep.subr.bf16.mxu1 %v2014_v46  ;;  %v2020_v41 = vld [vmem:[%s2508_s4 + $0x28] sm:$0xff]   ;;  %v2021_v42 = vld [vmem:[%s2508_s4 + $0x30] sm:$0xff]  }
 0x3cf   :  { %v826_v49 = vadd.f32 %v822_v43, %v791_v38  ;;  %v825_v48 = vadd.f32 %v821_v44, %v791_v38  ;;  %v828_v55 = vadd.f32 %v824_v47, %v791_v38  ;;  %v827_v45 = vadd.f32 %v823_v50, %v791_v38  ;;  %1866 = vmatpush3.bf16.msra.mxu0 %v2014_v46  ;;  %v2022_v43 = vld [vmem:[%s2508_s4 + $0x38] ss:$0 sps:$4 sm:$0xff]  }
 0x3d0   :  { %v797_v56 = vmax.f32 %v793_v51, 0.0  ;;  %v796_v28 = vmax.f32 %v792_v52, 0.0  ;;  %1896 = vmatpush3.bf16.msra.mxu1 %v2014_v46  ;;  %v799_v25 = vmax.f32 %v795_v53, 0.0  ;;  %v798_v27 = vmax.f32 %v794_v54, 0.0  ;;  %1867 = vmatprep.subr.bf16.mxu0 %v2015_v24 }
 0x3d1   :  { %1897 = vmatprep.subr.bf16.mxu1 %v2015_v24  ;;  %v830_v60 = vmax.f32 %v826_v49, 0.0  ;;  %v829_v61 = vmax.f32 %v825_v48, 0.0  ;;  %v832_v62 = vmax.f32 %v828_v55, 0.0  ;;  %v831_v0 = vmax.f32 %v827_v45, 0.0 }
 0x3d2   :  { %806 = vrot.lane.b32.xlu1 %v797_v56, %s2028_s15  ;;  %804 = vrot.lane.b32.xlu0 %v796_v28, %s2028_s15  ;;  %v972_v40 = vsel %vm120_vm5, %v2019_v36, 0  ;;  %v1057_v44 = vsel %vm120_vm5, %v2022_v43, 0 }
 0x3d3   :  { %1868 = vmatpush3.bf16.msra.mxu0 %v2015_v24 }
 0x3d4   :  { %1898 = vmatpush3.bf16.msra.mxu1 %v2015_v24  ;;  %1991 = vmatprep.subr.msk.bf16.mxu0 %vm120_vm5, %v2016_v57 }
 0x3d5   :  { %1994 = vmatprep.subr.msk.bf16.mxu1 %vm120_vm5, %v2016_v57 }
 0x3d6   :  { %810 = vrot.lane.b32.xlu1 %v799_v25, %s2028_s15  ;;  %808 = vrot.lane.b32.xlu0 %v798_v27, %s2028_s15 }
 0x3d7   :  { %1870 = vmatpush3.bf16.msra.mxu0 %v899_v58 }
 0x3d8   :  { %1900 = vmatpush3.bf16.msra.mxu1 %v899_v58  ;;  %1875 = vmatprep.subr.bf16.mxu0 %v2318_v59 }
 0x3d9   :  { %1905 = vmatprep.subr.bf16.mxu1 %v2318_v59 }
 0x3da   :  { %839 = vrot.lane.b32.xlu1 %v830_v60, %s2033_s16  ;;  %837 = vrot.lane.b32.xlu0 %v829_v61, %s2033_s16 }
 0x3de   :  { %843 = vrot.lane.b32.xlu1 %v832_v62, %s2033_s16  ;;  %841 = vrot.lane.b32.xlu0 %v831_v0, %s2033_s16 }
 0x444   :  { %v807_v1 = vpop.permute.xlu1 %806  ;;  %v805_v4 = vpop.permute.xlu0 %804 }
 0x445   :  { %818 = vst.msk [vmem:[#allocation2 + $0xa] sm:$0xff] %vm816_vm11, %v807_v1  ;;  %817 = vst.msk [vmem:[#allocation2 + $0x2] sm:$0xff] %vm816_vm11, %v805_v4 }
 0x448   :  { %v811_v5 = vpop.permute.xlu1 %810  ;;  %v809_v6 = vpop.permute.xlu0 %808 }
 0x449   :  { %820 = vst.msk [vmem:[#allocation2 + $0x1a] sm:$0xff] %vm816_vm11, %v811_v5  ;;  %819 = vst.msk [vmem:[#allocation2 + $0x12] sm:$0xff] %vm816_vm11, %v809_v6 }
 0x44c   :  { %v840_v7 = vpop.permute.xlu1 %839  ;;  %v838_v8 = vpop.permute.xlu0 %837 }
 0x44d   :  { %851 = vst.msk [vmem:[#allocation2 + $0xa] sm:$0xff] %vm849_vm12, %v840_v7  ;;  %850 = vst.msk [vmem:[#allocation2 + $0x2] sm:$0xff] %vm849_vm12, %v838_v8 }
 0x450   :  { %v844_v10 = vpop.permute.xlu1 %843  ;;  %v842_v11 = vpop.permute.xlu0 %841 }
 0x451   :  { %853 = vst.msk [vmem:[#allocation2 + $0x1a] sm:$0xff] %vm849_vm12, %v844_v10  ;;  %852 = vst.msk [vmem:[#allocation2 + $0x12] sm:$0xff] %vm849_vm12, %v842_v11 }
 0x454   :  { %v865_v12 = vld [vmem:[#allocation2 + $0x2] sm:$0xff]  ;;  %v866_v13 = vld [vmem:[#allocation2 + $0xa] sm:$0xff] }
 0x455   :  { %v869_v14 = vpack.c.bf16 %v866_v13, %v865_v12  ;;  %v854_v15 = vld [vmem:[#allocation2] sm:$0xff]  ;;  %v855_v18 = vld [vmem:[#allocation2 + $0x8] sm:$0xff] }
 0x456   :  { %v858_v21 = vpack.c.bf16 %v855_v18, %v854_v15  ;;  %v1023_v32 = vld [vmem:[#allocation2 + $0x4] sm:$0xff] }
 0x457   :  { %1146 = vrot.lane.b32.xlu0 %v869_v14, %s2029_s26  ;;  %1871 = vmatprep.mubr.msk.bf16.mxu0 %vm113_vm7, %v869_v14 }
 0x458   :  { %v867_v19 = vld [vmem:[#allocation2 + $0x12] sm:$0xff]  ;;  %v868_v20 = vld [vmem:[#allocation2 + $0x1a] sm:$0xff] }
 0x459   :  { %v870_v22 = vpack.c.bf16 %v868_v20, %v867_v19  ;;  %v1024_v26 = vld [vmem:[#allocation2 + $0xc] sm:$0xff]  ;;  %v857_v31 = vld [vmem:[#allocation2 + $0x18] sm:$0xff] }
 0x45a   :  { %v856_v29 = vld [vmem:[#allocation2 + $0x10] sm:$0xff]  ;;  %v1027_v33 = vpack.c.bf16 %v1024_v26, %v1023_v32  ;;  %v1026_v38 = vld [vmem:[#allocation2 + $0x1c] sm:$0xff] }
 0x45b   :  { %1207 = vrot.lane.b32.xlu0 %v858_v21, %s2029_s26  ;;  %1148 = vrot.lane.b32.xlu1 %v870_v22, %s2029_s26  ;;  %v859_v35 = vpack.c.bf16 %v857_v31, %v856_v29  ;;  %v1025_v37 = vld [vmem:[#allocation2 + $0x14] sm:$0xff] }
 0x45c   :  { %1872 = vmatmul.mubr.msk.bf16.vlgmr.msra.gmra.mrb[8].mxu0 %vm113_vm7, %v870_v22  ;;  %v1028_v39 = vpack.c.bf16 %v1026_v38, %v1025_v37 }
 0x45d   :  { %1876 = vmatpush3.bf16.msra.mxu0 %v2318_v59  ;;  %1881 = vmatprep.mubr.msk.bf16.mxu0 %vm113_vm7, %v858_v21 }
 0x45e   :  { %1877 = vmatprep.subr.bf16.mxu0 %v2018_v23 }
 0x45f   :  { %1268 = vrot.lane.b32.xlu0 %v1027_v33, %s2029_s26  ;;  %1209 = vrot.lane.b32.xlu1 %v859_v35, %s2029_s26 }
 0x461   :  { %1878 = vmatpush3.bf16.msra.mxu0 %v2018_v23 }
 0x462   :  { %1992 = vmatprep.subr.msk.bf16.mxu0 %vm120_vm5, %v2019_v36 }
 0x463   :  { %1270 = vrot.lane.b32.xlu1 %v1028_v39, %s2029_s26 }
 0x465   :  { %1880 = vmatpush3.bf16.msra.mxu0 %v972_v40 }
 0x466   :  { %1885 = vmatprep.subr.bf16.mxu0 %v2020_v41 }
 0x468   :  { %1882 = vmatmul.mubr.msk.bf16.vlgmr.msra.gmra.mrb[8].mxu0 %vm113_vm7, %v859_v35 }
 0x469   :  { %1886 = vmatpush3.bf16.msra.mxu0 %v2020_v41  ;;  %1891 = vmatprep.mubr.msk.bf16.mxu0 %vm113_vm7, %v1027_v33 }
 0x46a   :  { %1887 = vmatprep.subr.bf16.mxu0 %v2021_v42 }
 0x46d   :  { %1888 = vmatpush3.bf16.msra.mxu0 %v2021_v42 }
 0x46e   :  { %1993 = vmatprep.subr.msk.bf16.mxu0 %vm120_vm5, %v2022_v43 }
 0x471   :  { %1890 = vmatpush3.bf16.msra.mxu0 %v1057_v44 }
 0x472   :  { %1947 = vmatprep.subr.bf16.mxu0 %v2030_v2 }
 0x474   :  { %1892 = vmatmul.mubr.msk.bf16.vlgmr.msra.gmra.mrb[8].mxu0 %vm113_vm7, %v1028_v39 }
 0x475   :  { %1949 = vmatpush3.bf16.msra.mxu0 %v2212_v63  ;;  %1933 = vmatprep.mubr.msk.f32.mxu0 %vm2031_vm9, %v2027_v3 }
 0x476   :  { %1950 = vmatprep.subr.bf16.mxu0 %v2030_v2 }
 0x479   :  { %1952 = vmatpush3.bf16.msra.mxu0 %v2227_v9 }
 0x4c9   :  { %v1147_v47 = vpop.permute.xlu0 %1146 }
 0x4ca   :  { %1901 = vmatprep.mubr.msk.bf16.mxu1 %vm113_vm7, %v1147_v47 }
 0x4cd   :  { %v1149_v50 = vpop.permute.xlu1 %1148  ;;  %v1208_v51 = vpop.permute.xlu0 %1207 }
 0x4ce   :  { %1902 = vmatmul.mubr.msk.bf16.vlgmr.msra.gmra.mrb[8].mxu1 %vm113_vm7, %v1149_v50 }
 0x4cf   :  { %1906 = vmatpush3.bf16.msra.mxu1 %v2318_v59  ;;  %1911 = vmatprep.mubr.msk.bf16.mxu1 %vm113_vm7, %v1208_v51 }
 0x4d0   :  { %1907 = vmatprep.subr.bf16.mxu1 %v2018_v23 }
 0x4d1   :  { %v1210_v63 = vpop.permute.xlu1 %1209  ;;  %v1269_v2 = vpop.permute.xlu0 %1268 }
 0x4d3   :  { %1908 = vmatpush3.bf16.msra.mxu1 %v2018_v23 }
 0x4d4   :  { %1995 = vmatprep.subr.msk.bf16.mxu1 %vm120_vm5, %v2019_v36 }
 0x4d5   :  { %v1271_v9 = vpop.permute.xlu1 %1270 }
 0x4d7   :  { %1910 = vmatpush3.bf16.msra.mxu1 %v972_v40 }
 0x4d8   :  { %1915 = vmatprep.subr.bf16.mxu1 %v2020_v41 }
 0x4da   :  { %1912 = vmatmul.mubr.msk.bf16.vlgmr.msra.gmra.mrb[8].mxu1 %vm113_vm7, %v1210_v63 }
 0x4db   :  { %1916 = vmatpush3.bf16.msra.mxu1 %v2020_v41  ;;  %1921 = vmatprep.mubr.msk.bf16.mxu1 %vm113_vm7, %v1269_v2 }
 0x4dc   :  { %1917 = vmatprep.subr.bf16.mxu1 %v2021_v42 }
 0x4df   :  { %1918 = vmatpush3.bf16.msra.mxu1 %v2021_v42 }
 0x4e0   :  { %1996 = vmatprep.subr.msk.bf16.mxu1 %vm120_vm5, %v2022_v43 }
 0x4e3   :  { %1920 = vmatpush3.bf16.msra.mxu1 %v1057_v44 }
 0x4e4   :  { %1936 = vmatprep.subr.mxu1 %v2027_v3 }
 0x4e6   :  { %1922 = vmatmul.mubr.msk.bf16.vlgmr.msra.gmra.mrb[8].mxu1 %vm113_vm7, %v1271_v9 }
 0x4e7   :  { %1938 = vmatprep.mubr.msk.f32.mxu1 %vm2031_vm9, %v2027_v3 }
 0x547   :  { %v2373_v52 = vpop.f32.mrb[8].mxu0 }
 0x548   :  { %v2375_v53 = vpop.f32.mrb[9].mxu0  ;;  %v1127_v48 = vmul.f32 %v2373_v52, %v2373_v52  ;;  %v1115_v28 = vsel %vm335_vm8, %v2373_v52, 0.0 }
 0x549   :  { %v1125_v54 = vmul.f32 %v2375_v53, %v2375_v53  ;;  %v2379_v46 = vpop.f32.mrb[10].mxu0  ;;  %v1112_v55 = vsel %vm335_vm8, %v2375_v53, 0.0 }
 0x54a   :  { %v2381_v49 = vpop.f32.mrb[11].mxu0  ;;  %v1128_v25 = vmul.f32 %v2379_v46, %v2379_v46  ;;  %v1132_v59 = vsel %vm335_vm8, %v1127_v48, 0.0  ;;  %v1117_v60 = vsel %vm335_vm8, %v2379_v46, 0.0 }
 0x54b   :  { %v1113_v3 = vsel %vm335_vm8, %v2381_v49, 0.0  ;;  %v1126_v45 = vmul.f32 %v2381_v49, %v2381_v49  ;;  %v1129_v24 = vsel %vm335_vm8, %v1125_v54, 0.0 }
 0x54c   :  { %v1114_v56 = vadd.f32 %v1113_v3, %v1112_v55  ;;  %v1134_v0 = vsel %vm335_vm8, %v1128_v25, 0.0 }
 0x54d   :  { %v1130_v27 = vsel %vm335_vm8, %v1126_v45, 0.0 }
 0x54e   :  { %v1116_v57 = vadd.f32 %v1115_v28, %v1114_v56  ;;  %v1131_v58 = vadd.f32 %v1130_v27, %v1129_v24 }
 0x550   :  { %v1118_v61 = vadd.f32 %v1117_v60, %v1116_v57  ;;  %v1133_v62 = vadd.f32 %v1132_v59, %v1131_v58  ;;  %v1477_v58 = vld [vmem:[%s2505_s8] sm:$0xf]  ;;  %v1595_v60 = vld [vmem:[%s2502_s0 + $0x8] sm:$0xff] }
 0x551   :  { %1937 = vmatpush3.msk.msra.mxu1 %vm120_vm5, %v1477_v58  ;;  %v1594_v59 = vld [vmem:[%s2502_s0] sm:$0xff]  ;;  %1604 = vrot.lane.b32.xlu1 %v1595_v60, %s2029_s26 }
 0x552   :  { %v1119_v1 = vrot.slane %v1118_v61, 4  ;;  %v1135_v4 = vadd.f32 %v1134_v0, %v1133_v62  ;;  %1602 = vrot.lane.b32.xlu0 %v1594_v59, %s2029_s26  ;;  %v1597_v62 = vld [vmem:[%s2502_s0 + $0x18] sm:$0xff] }
 0x554   :  { %v1120_v5 = vadd.f32 %v1119_v1, %v1118_v61  ;;  %v1136_v6 = vrot.slane %v1135_v4, 4  ;;  %v1596_v61 = vld [vmem:[%s2502_s0 + $0x10] sm:$0xff] }
 0x555   :  { %1608 = vrot.lane.b32.xlu1 %v1597_v62, %s2029_s26 }
 0x556   :  { %v1121_v7 = vrot.slane %v1120_v5, 2  ;;  %v1137_v8 = vadd.f32 %v1136_v6, %v1135_v4  ;;  %1606 = vrot.lane.b32.xlu0 %v1596_v61, %s2029_s26 }
 0x558   :  { %v1122_v10 = vadd.f32 %v1121_v7, %v1120_v5  ;;  %v1138_v11 = vrot.slane %v1137_v8, 2 }
 0x55a   :  { %v1123_v12 = vrot.slane %v1122_v10, 1  ;;  %v1139_v13 = vadd.f32 %v1138_v11, %v1137_v8 }
 0x55c   :  { %v1140_v14 = vrot.slane %v1139_v13, 1  ;;  %v1124_v15 = vadd.f32 %v1123_v12, %v1122_v10 }
 0x55e   :  { %v1141_v18 = vadd.f32 %v1140_v14, %v1139_v13  ;;  %v1448_v13 = vld [vmem:[%s2509_s5] sm:$0x1]  ;;  %s2034_s5 = smov 32  }
 0x560   :  { %v1142_v19 = vsel %vm366_vm10, %v1124_v15, %v1141_v18  ;;  %v1467_v18 = vld [vmem:[%s2510_s6] sm:$0x1] }
 0x5b9   :  { %v2402_v20 = vpop.f32.mrb[8].mxu1 }
 0x5ba   :  { %v2404_v21 = vpop.f32.mrb[9].mxu1  ;;  %v1346_v29 = vmul.f32 %v2402_v20, %v2402_v20  ;;  %v1334_v36 = vsel %vm335_vm8, %v2402_v20, 0.0 }
 0x5bb   :  { %v1344_v22 = vmul.f32 %v2404_v21, %v2404_v21  ;;  %v2408_v23 = vpop.f32.mrb[10].mxu1  ;;  %v1331_v31 = vsel %vm335_vm8, %v2404_v21, 0.0 }
 0x5bc   :  { %v2410_v26 = vpop.f32.mrb[11].mxu1  ;;  %v1347_v38 = vmul.f32 %v2408_v23, %v2408_v23  ;;  %v1351_v42 = vsel %vm335_vm8, %v1346_v29, 0.0  ;;  %v1336_v43 = vsel %vm335_vm8, %v2408_v23, 0.0 }
 0x5bd   :  { %v1332_v32 = vsel %vm335_vm8, %v2410_v26, 0.0  ;;  %v1345_v33 = vmul.f32 %v2410_v26, %v2410_v26  ;;  %v1348_v37 = vsel %vm335_vm8, %v1344_v22, 0.0 }
 0x5be   :  { %v1333_v35 = vadd.f32 %v1332_v32, %v1331_v31  ;;  %v1353_v50 = vsel %vm335_vm8, %v1347_v38, 0.0 }
 0x5bf   :  { %v1349_v39 = vsel %vm335_vm8, %v1345_v33, 0.0 }
 0x5c0   :  { %v1335_v40 = vadd.f32 %v1334_v36, %v1333_v35  ;;  %v1350_v41 = vadd.f32 %v1349_v39, %v1348_v37 }
 0x5c2   :  { %v1337_v44 = vadd.f32 %v1336_v43, %v1335_v40  ;;  %v1352_v47 = vadd.f32 %v1351_v42, %v1350_v41 }
 0x5c3   :  { %v1605_v32 = vpop.permute.xlu1 %1604 }
 0x5c4   :  { %v1338_v51 = vrot.slane %v1337_v44, 4  ;;  %v1354_v63 = vadd.f32 %v1353_v50, %v1352_v47  ;;  %v1603_v35 = vpop.permute.xlu0 %1602 }
 0x5c6   :  { %v1339_v2 = vadd.f32 %v1338_v51, %v1337_v44  ;;  %v1355_v9 = vrot.slane %v1354_v63, 4 }
 0x5c7   :  { %v1609_v51 = vpop.permute.xlu1 %1608 }
 0x5c8   :  { %v1340_v54 = vrot.slane %v1339_v2, 2  ;;  %v1356_v48 = vadd.f32 %v1355_v9, %v1354_v63 }
 0x5ca   :  { %v1341_v55 = vadd.f32 %v1340_v54, %v1339_v2  ;;  %v1357_v3 = vrot.slane %v1356_v48, 2 }
 0x5cc   :  { %v1342_v45 = vrot.slane %v1341_v55, 1  ;;  %v1358_v56 = vadd.f32 %v1357_v3, %v1356_v48 }
 0x5ce   :  { %v1359_v28 = vrot.slane %v1358_v56, 1  ;;  %v1343_v24 = vadd.f32 %v1342_v45, %v1341_v55 }
 0x5d0   :  { %v1360_v25 = vadd.f32 %v1359_v28, %v1358_v56 }
 0x5d2   :  { %v1361_v27 = vsel %vm366_vm10, %v1343_v24, %v1360_v25 }
 0x5d3   :  { %v1362_v57 = vadd.f32 %v1361_v27, %v1142_v19 }
 0x5d5   :  { %1934 = vmatmul.mubr.msk.f32.vlgmr.msra.gmra.mrb[6].mxu0 %vm335_vm8, %v1362_v57 }
 0x6a8   :  { %v1436_v0 = vpop.f32.mrb[6].mxu0 }
 0x6a9   :  { %v1440_v1 = vmul.f32 0.001953125, %v1436_v0  ;;  %v1935_v4 = vpop.f32.mrb[7].mxu0 }
 0x6ab   :  { %v1441_v5 = vmul.f32 %v1440_v1, %v1440_v1 }
 0x6ad   :  { %v1443_v6 = vrot.slane %v1441_v5, 7 }
 0x6af   :  { %v1445_v7 = vsub.f32 %v1440_v1, %v1443_v6 }
 0x6b1   :  { %v1446_v8 = vadd.f32 1e-05, %v1445_v7 }
 0x6b3   :  { %2025 = vrsqrt.f32 %v1446_v8 }
 0x6bd   :  { %v2026_v10 = vpop.eup %2025 }
 0x6be   :  { %v1456_v11 = vrot.slane %v2026_v10, %v2272_v17 }
 0x6c0   :  { %v1457_v12 = vcombine.high %v1456_v11, %v1456_v11 }
 0x6c2   :  { %v1464_v14 = vrot.slane %v1457_v12, %v2272_v17 }
 0x6c4   :  { %v1466_v15 = vmul.f32 %v1464_v14, %v1448_v13 }
 0x6c6   :  { %v1468_v19 = vmul.f32 %v1466_v15, %v1440_v1 }
 0x6c8   :  { %v1469_v22 = vsub.f32 %v1467_v18, %v1468_v19 }
 0x6ca   :  { %v1474_v29 = vrot.slane %v1469_v22, %v2283_v30 }
 0x6cc   :  { %v1476_v31 = vsel %vm366_vm10, %v1466_v15, %v1474_v29 }
 0x6cd   :  { %1939 = vmatmul.mubr.msk.f32.vlgmr.msra.gmra.mrb[6].mxu1 %vm36_vm0, %v1476_v31 }
 0x7a0   :  { %v1550_v33 = vpop.f32.mrb[6].mxu1 }
 0x7a1   :  { %v1557_v36 = vrot.slane %v1550_v33, %v2283_v30  ;;  %v1940_v37 = vpop.f32.mrb[7].mxu1  ;;  %v1565_v17 = vrot.slane %v1550_v33, %v790_v34 }
 0x7a3   :  { %v1587_v38 = vmul.f32 %v1557_v36, %v2410_v26  ;;  %v1586_v39 = vmul.f32 %v1557_v36, %v2404_v21  ;;  %v1589_v40 = vmul.f32 %v2408_v23, %v1557_v36  ;;  %v1588_v41 = vmul.f32 %v2402_v20, %v1557_v36  ;;  %v1607_v26 = vpop.permute.xlu0 %1606 }
 0x7a4   :  { %v1559_v42 = vmul.f32 %v1557_v36, %v2381_v49  ;;  %v1558_v43 = vmul.f32 %v1557_v36, %v2375_v53  ;;  %v1561_v44 = vmul.f32 %v2379_v46, %v1557_v36  ;;  %v1560_v30 = vmul.f32 %v2373_v52, %v1557_v36 }
 0x7a5   :  { %v1591_v47 = vadd.f32 %v1587_v38, %v1565_v17  ;;  %v1590_v50 = vadd.f32 %v1586_v39, %v1565_v17  ;;  %v1593_v16 = vadd.f32 %v1589_v40, %v1565_v17  ;;  %v1592_v34 = vadd.f32 %v1588_v41, %v1565_v17 }
 0x7a6   :  { %v1567_v63 = vadd.f32 %v1565_v17, %v1559_v42  ;;  %v1566_v21 = vadd.f32 %v1565_v17, %v1558_v43  ;;  %v1569_v2 = vadd.f32 %v1565_v17, %v1561_v44  ;;  %v1568_v23 = vadd.f32 %v1565_v17, %v1560_v30 }
 0x7a7   :  { %v1615_v9 = vadd.f32 %v1605_v32, %v1591_v47  ;;  %v1614_v20 = vadd.f32 %v1603_v35, %v1590_v50  ;;  %v1617_v3 = vadd.f32 %v1609_v51, %v1593_v16  ;;  %v1616_v52 = vadd.f32 %v1607_v26, %v1592_v34 }
 0x7a8   :  { %v1575_v54 = vadd.f32 %v1595_v60, %v1567_v63  ;;  %v1574_v49 = vadd.f32 %v1594_v59, %v1566_v21  ;;  %v1577_v48 = vadd.f32 %v1597_v62, %v1569_v2  ;;  %v1576_v53 = vadd.f32 %v1596_v61, %v1568_v23 }
 0x7a9   :  { %v1619_v55 = vmax.f32 %v1615_v9, 0.0  ;;  %v1618_v46 = vmax.f32 %v1614_v20, 0.0  ;;  %v1621_v25 = vmax.f32 %v1617_v3, 0.0  ;;  %v1620_v27 = vmax.f32 %v1616_v52, 0.0 }
 0x7aa   :  { %v1579_v45 = vmax.f32 %v1575_v54, 0.0  ;;  %v1578_v56 = vmax.f32 %v1574_v49, 0.0  ;;  %v1581_v28 = vmax.f32 %v1577_v48, 0.0  ;;  %v1580_v24 = vmax.f32 %v1576_v53, 0.0 }
 0x7ab   :  { %1628 = vrot.lane.b32.xlu1 %v1619_v55, %s2034_s5  ;;  %1626 = vrot.lane.b32.xlu0 %v1618_v46, %s2034_s5 }
 0x7ac   :  { %1583 = vst.msk [vmem:[%s2511_s9 + $0x8] sm:$0xff] %vm335_vm8, %v1579_v45  ;;  %1582 = vst.msk [vmem:[%s2511_s9] sm:$0xff] %vm335_vm8, %v1578_v56 }
 0x7ad   :  { %1585 = vst.msk [vmem:[%s2511_s9 + $0x18] sm:$0xff] %vm335_vm8, %v1581_v28  ;;  %1584 = vst.msk [vmem:[%s2511_s9 + $0x10] sm:$0xff] %vm335_vm8, %v1580_v24 }
 0x7af   :  { %1632 = vrot.lane.b32.xlu1 %v1621_v25, %s2034_s5  ;;  %1630 = vrot.lane.b32.xlu0 %v1620_v27, %s2034_s5 }
 0x81d   :  { %v1629_v57 = vpop.permute.xlu1 %1628  ;;  %v1627_v58 = vpop.permute.xlu0 %1626 }
 0x81e   :  { %1640 = vst.msk [vmem:[%s2511_s9 + $0x8] sm:$0xff] %vm1638_vm13, %v1629_v57  ;;  %1639 = vst.msk [vmem:[%s2511_s9] sm:$0xff] %vm1638_vm13, %v1627_v58 }
 0x821   :  { %v1633_v59 = vpop.permute.xlu1 %1632  ;;  %v1631_v60 = vpop.permute.xlu0 %1630 }
 0x822   :  { %1642 = vst.msk [vmem:[%s2511_s9 + $0x18] sm:$0xff] %vm1638_vm13, %v1633_v59  ;;  %1641 = vst.msk [vmem:[%s2511_s9 + $0x10] sm:$0xff] %vm1638_vm13, %v1631_v60 }

</bundles_post_ra>
